<compile_context>
chip_gen: v5e
topology: v5e:2x2
jax: 0.10.0
libtpu: 0.0.40
codegen_flags: <defaults>
</compile_context>

<pallas_src>
import functools
import math

import jax
import jax.numpy as jnp
from jax import lax
from jax.experimental import pallas as pl
from jax.experimental.pallas import tpu as pltpu


# ----------------------------- tiling helpers --------------------------------

def _choose_tile(dim, preferred, align):
    """Largest tile <= preferred that is `align`-aligned and divides dim; else the full dim."""
    if dim <= preferred:
        return dim
    t = (preferred // align) * align
    while t >= align:
        if dim % t == 0:
            return t
        t -= align
    return dim


# ----------------------------- Pallas kernels --------------------------------

def _add_pos_kernel(x_ref, pos_ref, o_ref):
    # x block: (1, L, D), pos block: (L, D) broadcast over batch.
    x = x_ref[...].astype(jnp.float32)
    p = pos_ref[...].astype(jnp.float32)
    o_ref[...] = (x + p).astype(o_ref.dtype)


def _ln_linear_kernel(x_ref, g_ref, b_ref, w_ref, bias_ref, o_ref, *, activation):
    # Fused LayerNorm (f32 stats, full K in VMEM) -> matmul with a (K, tn) weight tile
    # -> bias -> optional QuickGELU epilogue.
    x = x_ref[...].astype(jnp.float32)                                  # (tm, K)
    mean = jnp.mean(x, axis=-1, keepdims=True)
    var = jnp.mean(jnp.square(x - mean), axis=-1, keepdims=True)
    xn = (x - mean) * lax.rsqrt(var + 1e-5)
    xn = xn * g_ref[...].astype(jnp.float32) + b_ref[...].astype(jnp.float32)
    acc = jnp.dot(xn.astype(w_ref.dtype), w_ref[...],
                  preferred_element_type=jnp.float32)                   # (tm, tn) f32
    acc = acc + bias_ref[...].astype(jnp.float32)
    if activation == "quick_gelu":
        acc = acc * jax.nn.sigmoid(1.702 * acc)                         # QuickGELU
    o_ref[...] = acc.astype(o_ref.dtype)


def _linear_residual_kernel(x_ref, w_ref, bias_ref, r_ref, o_ref, acc_ref):
    # K-tiled matmul with f32 VMEM accumulator; bias + residual add fused into the epilogue.
    @pl.when(pl.program_id(2) == 0)
    def _():
        acc_ref[...] = jnp.zeros_like(acc_ref)

    acc_ref[...] += jnp.dot(x_ref[...], w_ref[...], preferred_element_type=jnp.float32)

    @pl.when(pl.program_id(2) == pl.num_programs(2) - 1)
    def _():
        out = acc_ref[...] + bias_ref[...].astype(jnp.float32) + r_ref[...].astype(jnp.float32)
        o_ref[...] = out.astype(o_ref.dtype)


def _mha_kernel(qkv_ref, bias_ref, o_ref, *, n_heads, scale):
    # One batch element per grid step; all heads processed from a single lane-dense (1, L, 3D) block.
    L = qkv_ref.shape[1]
    D = qkv_ref.shape[2] // 3
    dh = D // n_heads
    bias = bias_ref[...]                                                # (L, L) f32 additive causal mask
    for h in range(n_heads):                                            # static, small head count
        q = qkv_ref[0, :, h * dh:(h + 1) * dh]                          # (L, dh)
        k = qkv_ref[0, :, D + h * dh:D + (h + 1) * dh]                  # (L, dh)
        v = qkv_ref[0, :, 2 * D + h * dh:2 * D + (h + 1) * dh]          # (L, dh)
        # trans-B dot_general: contract last dims directly, no k.T materialization.
        s = lax.dot_general(q, k, (((1,), (1,)), ((), ())),
                            preferred_element_type=jnp.float32)         # (L, L) f32
        s = s * scale + bias
        m = jnp.max(s, axis=-1, keepdims=True)
        p = jnp.exp(s - m)
        denom = jnp.sum(p, axis=-1, keepdims=True)
        p = p * pl.reciprocal(denom, approx=True)                       # EUP reciprocal, ~free slot
        o = jnp.dot(p.astype(v.dtype), v, preferred_element_type=jnp.float32)
        o_ref[0, :, h * dh:(h + 1) * dh] = o.astype(o_ref.dtype)


# ----------------------------- wrappers ---------------------------------------

def pallas_add_pos(x, pos):
    B, L, D = x.shape
    return pl.pallas_call(
        _add_pos_kernel,
        grid=(B,),
        in_specs=[pl.BlockSpec((1, L, D), lambda b: (b, 0, 0)),
                  pl.BlockSpec((L, D), lambda b: (0, 0))],
        out_specs=pl.BlockSpec((1, L, D), lambda b: (b, 0, 0)),
        out_shape=jax.ShapeDtypeStruct((B, L, D), x.dtype),
        compiler_params=pltpu.CompilerParams(dimension_semantics=("parallel",)),
    )(x, pos)


def pallas_ln_linear(x2d, gamma, beta, w, bias, activation=None, out_dtype=None,
                     tm_target=256, tn_target=256):
    """out = act( LayerNorm(x2d) @ w + bias ). Full-K blocks (LN needs the whole row)."""
    M, K = x2d.shape
    Kw, N = w.shape
    assert K == Kw
    out_dtype = out_dtype or x2d.dtype
    tm = _choose_tile(M, tm_target, 8)
    tn = _choose_tile(N, tn_target, 128)
    grid = (M // tm, N // tn)
    flops = 2 * M * N * K
    bytes_accessed = int(x2d.size * x2d.dtype.itemsize + w.size * w.dtype.itemsize
                         + M * N * jnp.dtype(out_dtype).itemsize)
    return pl.pallas_call(
        functools.partial(_ln_linear_kernel, activation=activation),
        grid=grid,
        in_specs=[
            pl.BlockSpec((tm, K), lambda i, j: (i, 0)),
            pl.BlockSpec((1, K), lambda i, j: (0, 0)),
            pl.BlockSpec((1, K), lambda i, j: (0, 0)),
            pl.BlockSpec((K, tn), lambda i, j: (0, j)),
            pl.BlockSpec((1, tn), lambda i, j: (0, j)),
        ],
        out_specs=pl.BlockSpec((tm, tn), lambda i, j: (i, j)),
        out_shape=jax.ShapeDtypeStruct((M, N), out_dtype),
        compiler_params=pltpu.CompilerParams(dimension_semantics=("parallel", "parallel")),
        cost_estimate=pl.CostEstimate(
            flops=flops,
            transcendentals=(M * N if activation == "quick_gelu" else 0),
            bytes_accessed=bytes_accessed),
    )(x2d, gamma.reshape(1, K), beta.reshape(1, K), w, bias.reshape(1, N))


def pallas_linear_residual(x2d, w, bias, residual, out_dtype=None,
                           tm_target=256, tn_target=256, tk_target=512):
    """out = x2d @ w + bias + residual, K-tiled with an f32 accumulator."""
    M, K = x2d.shape
    Kw, N = w.shape
    assert K == Kw and residual.shape == (M, N)
    out_dtype = out_dtype or residual.dtype
    tm = _choose_tile(M, tm_target, 8)
    tn = _choose_tile(N, tn_target, 128)
    tk = _choose_tile(K, tk_target, 128)
    grid = (M // tm, N // tn, K // tk)
    flops = 2 * M * N * K
    bytes_accessed = int(x2d.size * x2d.dtype.itemsize + w.size * w.dtype.itemsize
                         + 2 * M * N * jnp.dtype(out_dtype).itemsize)
    return pl.pallas_call(
        _linear_residual_kernel,
        grid=grid,
        in_specs=[
            pl.BlockSpec((tm, tk), lambda i, j, k: (i, k)),
            pl.BlockSpec((tk, tn), lambda i, j, k: (k, j)),
            pl.BlockSpec((1, tn), lambda i, j, k: (0, j)),
            pl.BlockSpec((tm, tn), lambda i, j, k: (i, j)),
        ],
        out_specs=pl.BlockSpec((tm, tn), lambda i, j, k: (i, j)),
        out_shape=jax.ShapeDtypeStruct((M, N), out_dtype),
        scratch_shapes=[pltpu.VMEM((tm, tn), jnp.float32)],
        compiler_params=pltpu.CompilerParams(
            dimension_semantics=("parallel", "parallel", "arbitrary")),
        cost_estimate=pl.CostEstimate(flops=flops, transcendentals=0,
                                      bytes_accessed=bytes_accessed),
    )(x2d, w, bias.reshape(1, N), residual)


def pallas_causal_mha(qkv, causal_bias, n_heads, out_dtype=None):
    # qkv: (B, L, 3D) packed [q | k | v] along the last dim (no XLA head transposes needed).
    B, L, threeD = qkv.shape
    D = threeD // 3
    dh = D // n_heads
    scale = 1.0 / math.sqrt(dh)
    out_dtype = out_dtype or qkv.dtype
    return pl.pallas_call(
        functools.partial(_mha_kernel, n_heads=n_heads, scale=scale),
        grid=(B,),
        in_specs=[pl.BlockSpec((1, L, threeD), lambda b: (b, 0, 0)),
                  pl.BlockSpec((L, L), lambda b: (0, 0))],
        out_specs=pl.BlockSpec((1, L, D), lambda b: (b, 0, 0)),
        out_shape=jax.ShapeDtypeStruct((B, L, D), out_dtype),
        compiler_params=pltpu.CompilerParams(dimension_semantics=("parallel",)),
    )(qkv, causal_bias)


# ----------------------------- model ------------------------------------------

def text_encoder_forward(params, prompts, tokenized_prompts, n_heads):
    B, L, D = prompts.shape
    act_dtype = params["pos"].dtype

    # x = prompts.type(dtype) + positional_embedding (elementwise kernel, grid over batch)
    x = pallas_add_pos(prompts.astype(act_dtype), params["pos"])
    x2d = x.reshape(B * L, D)

    # Additive causal mask built once (finite -1e30, not -inf, per review).
    causal_bias = jnp.triu(jnp.full((L, L), -1e30, dtype=jnp.float32), k=1)

    for blk in params["blocks"]:
        # --- attention sub-block: LN1 fused into the QKV projection ---
        qkv = pallas_ln_linear(x2d, blk["ln1_g"], blk["ln1_b"], blk["in_w"], blk["in_b"])
        attn = pallas_causal_mha(qkv.reshape(B, L, 3 * D), causal_bias, n_heads)
        # out-proj with residual add fused into the epilogue
        x2d = pallas_linear_residual(attn.reshape(B * L, D), blk["out_w"], blk["out_b"], x2d)

        # --- MLP sub-block: LN2 + c_fc + QuickGELU fused; residual fused into c_proj ---
        h = pallas_ln_linear(x2d, blk["ln2_g"], blk["ln2_b"], blk["fc_w"], blk["fc_b"],
                             activation="quick_gelu")
        x2d = pallas_linear_residual(h, blk["proj_w"], blk["proj_b"], x2d)

    # Gather the EOT rows BEFORE ln_final (LayerNorm is per-row so this commutes) — only B rows
    # get normalized/projected instead of B*L.
    eot = jnp.argmax(tokenized_prompts, axis=-1)                     # (B,)
    pooled = x2d.reshape(B, L, D)[jnp.arange(B), eot]                # (B, D) gather (plain-JAX glue)

    # ln_final fused into the text_projection matmul (no bias).
    E = params["text_projection"].shape[1]
    out = pallas_ln_linear(pooled, params["lnf_g"], params["lnf_b"],
                           params["text_projection"], jnp.zeros((E,), jnp.float32),
                           out_dtype=jnp.float32)
    return out


# ----------------------------- params ------------------------------------------

def init_params(key, n_layers, width, embed_dim, ctx_len, dtype=jnp.bfloat16):
    """All matmul weights are stored pre-transposed to (K, N) = (in, out) layout, i.e. the
    one-time transpose of the corresponding PyTorch weights happens here, not per forward."""
    def nrm(k, shape, std=0.02):
        return (std * jax.random.normal(k, shape, jnp.float32)).astype(dtype)

    keys = jax.random.split(key, 2 + n_layers)
    params = {
        "pos": nrm(keys[0], (ctx_len, width), 0.01),
        "lnf_g": jnp.ones((width,), jnp.float32),
        "lnf_b": jnp.zeros((width,), jnp.float32),
        "text_projection": nrm(keys[1], (width, embed_dim), width ** -0.5),   # already (K, N)
        "blocks": [],
    }
    for i in range(n_layers):
        ks = jax.random.split(keys[2 + i], 5)
        params["blocks"].append({
            "ln1_g": jnp.ones((width,), jnp.float32),
            "ln1_b": jnp.zeros((width,), jnp.float32),
            "ln2_g": jnp.ones((width,), jnp.float32),
            "ln2_b": jnp.zeros((width,), jnp.float32),
            "in_w": nrm(ks[0], (width, 3 * width)),      # in_proj_weight.T  (D, 3D)
            "in_b": nrm(ks[1], (3 * width,)),
            "out_w": nrm(ks[2], (width, width)),          # out_proj.weight.T (D, D)
            "out_b": jnp.zeros((width,), dtype),
            "fc_w": nrm(ks[3], (width, 4 * width)),       # mlp.c_fc.weight.T (D, 4D)
            "fc_b": jnp.zeros((4 * width,), dtype),
            "proj_w": nrm(ks[4], (4 * width, width)),     # mlp.c_proj.weight.T (4D, D)
            "proj_b": jnp.zeros((width,), dtype),
        })
    return params


if __name__ == "__main__":
    B, L, D, H, N_LAYERS, E = 2, 8, 32, 4, 2, 16

    key = jax.random.PRNGKey(0)
    k_params, k_prompts, k_tok = jax.random.split(key, 3)

    params = init_params(k_params, N_LAYERS, D, E, L, dtype=jnp.bfloat16)
    prompts = jax.random.normal(k_prompts, (B, L, D), jnp.float32)             # learned prompt embeddings
    tokenized_prompts = jax.random.randint(k_tok, (B, L), 0, 1000, jnp.int32)  # token ids; argmax = EOT pos

    fwd = jax.jit(functools.partial(text_encoder_forward, n_heads=H))
    out = fwd(params, prompts, tokenized_prompts)
    out = jax.block_until_ready(out)
    assert out.shape == (B, E), out.shape
    assert jnp.all(jnp.isfinite(out))
    print("KERNEL_OK")
</pallas_src>

<mosaic_0001>
module attributes {stable_mosaic.version = 11 : i64} {
  func.func @_ln_linear_kernel(%arg0: i32, %arg1: i32, %arg2: memref<16x32xbf16, #tpu.memory_space<vmem>>, %arg3: memref<1x32xf32, #tpu.memory_space<vmem>>, %arg4: memref<1x32xf32, #tpu.memory_space<vmem>>, %arg5: memref<32x96xbf16, #tpu.memory_space<vmem>>, %arg6: memref<1x96xbf16, #tpu.memory_space<vmem>>, %arg7: memref<16x96xbf16, #tpu.memory_space<vmem>>) attributes {dimension_semantics = [#tpu.dimension_semantics<parallel>, #tpu.dimension_semantics<parallel>], iteration_bounds = array<i64: 1, 1>, scalar_prefetch = 0 : i64, scratch_operands = 0 : i64, tpu.core_type = #tpu.core_type<tc>, window_params = [{transform_indices = @transform_0, window_bounds = array<i64: 16, 32>}, {pipeline_mode = #tpu.pipeline_mode<synchronous>, transform_indices = @transform_1, window_bounds = array<i64: 1, 32>}, {pipeline_mode = #tpu.pipeline_mode<synchronous>, transform_indices = @transform_2, window_bounds = array<i64: 1, 32>}, {transform_indices = @transform_3, window_bounds = array<i64: 32, 96>}, {transform_indices = @transform_4, window_bounds = array<i64: 1, 96>}, {transform_indices = @transform_5, window_bounds = array<i64: 16, 96>}]} {
    %c0 = arith.constant 0 : index
    %c0_0 = arith.constant 0 : index
    %0 = vector.load %arg2[%c0, %c0_0] : memref<16x32xbf16, #tpu.memory_space<vmem>>, vector<16x32xbf16>
    %1 = arith.extf %0 : vector<16x32xbf16> to vector<16x32xf32>
    %cst = arith.constant dense<0.000000e+00> : vector<16xf32>
    %2 = vector.multi_reduction <add>, %1, %cst [1] : vector<16x32xf32> to vector<16xf32>
    %3 = vector.shape_cast %2 : vector<16xf32> to vector<16x1xf32>
    %cst_1 = arith.constant 3.200000e+01 : f32
    %4 = vector.broadcast %cst_1 : f32 to vector<16x1xf32>
    %5 = arith.divf %3, %4 : vector<16x1xf32>
    %6 = vector.broadcast %5 : vector<16x1xf32> to vector<16x32xf32>
    %7 = arith.subf %1, %6 : vector<16x32xf32>
    %8 = arith.mulf %7, %7 : vector<16x32xf32>
    %cst_2 = arith.constant dense<0.000000e+00> : vector<16xf32>
    %9 = vector.multi_reduction <add>, %8, %cst_2 [1] : vector<16x32xf32> to vector<16xf32>
    %10 = vector.shape_cast %9 : vector<16xf32> to vector<16x1xf32>
    %cst_3 = arith.constant 3.200000e+01 : f32
    %11 = vector.broadcast %cst_3 : f32 to vector<16x1xf32>
    %12 = arith.divf %10, %11 : vector<16x1xf32>
    %13 = vector.broadcast %5 : vector<16x1xf32> to vector<16x32xf32>
    %14 = arith.subf %1, %13 : vector<16x32xf32>
    %cst_4 = arith.constant 9.99999974E-6 : f32
    %15 = vector.broadcast %cst_4 : f32 to vector<16x1xf32>
    %16 = arith.addf %12, %15 : vector<16x1xf32>
    %17 = math.rsqrt %16 : vector<16x1xf32>
    %18 = vector.broadcast %17 : vector<16x1xf32> to vector<16x32xf32>
    %19 = arith.mulf %14, %18 : vector<16x32xf32>
    %c0_5 = arith.constant 0 : index
    %c0_6 = arith.constant 0 : index
    %20 = vector.load %arg3[%c0_5, %c0_6] : memref<1x32xf32, #tpu.memory_space<vmem>>, vector<1x32xf32>
    %21 = vector.broadcast %20 : vector<1x32xf32> to vector<16x32xf32>
    %22 = arith.mulf %19, %21 : vector<16x32xf32>
    %c0_7 = arith.constant 0 : index
    %c0_8 = arith.constant 0 : index
    %23 = vector.load %arg4[%c0_7, %c0_8] : memref<1x32xf32, #tpu.memory_space<vmem>>, vector<1x32xf32>
    %24 = vector.broadcast %23 : vector<1x32xf32> to vector<16x32xf32>
    %25 = arith.addf %22, %24 : vector<16x32xf32>
    %26 = arith.truncf %25 : vector<16x32xf32> to vector<16x32xbf16>
    %c0_9 = arith.constant 0 : index
    %c0_10 = arith.constant 0 : index
    %27 = vector.load %arg5[%c0_9, %c0_10] : memref<32x96xbf16, #tpu.memory_space<vmem>>, vector<32x96xbf16>
    %cst_11 = arith.constant dense<0.000000e+00> : vector<16x96xf32>
    %28 = tpu.matmul %26, %27, %cst_11 {dimension_numbers = #tpu.dot_dimension_numbers<[1], [0], [0], [1], [0, 0, 1, 1], [], []>} : vector<16x32xbf16>, vector<32x96xbf16>, vector<16x96xf32> -> vector<16x96xf32>
    %c0_12 = arith.constant 0 : index
    %c0_13 = arith.constant 0 : index
    %29 = vector.load %arg6[%c0_12, %c0_13] : memref<1x96xbf16, #tpu.memory_space<vmem>>, vector<1x96xbf16>
    %30 = arith.extf %29 : vector<1x96xbf16> to vector<1x96xf32>
    %31 = vector.broadcast %30 : vector<1x96xf32> to vector<16x96xf32>
    %32 = arith.addf %28, %31 : vector<16x96xf32>
    %33 = arith.truncf %32 : vector<16x96xf32> to vector<16x96xbf16>
    %c0_14 = arith.constant 0 : index
    %c0_15 = arith.constant 0 : index
    %34 = vector.load %arg7[%c0_14, %c0_15] : memref<16x96xbf16, #tpu.memory_space<vmem>>, vector<16x96xbf16>
    tpu.vector_store %arg7[%c0_14, %c0_15], %33 {strides = array<i32>} : memref<16x96xbf16, #tpu.memory_space<vmem>>, vector<16x96xbf16>,
    return
  }
  func.func @transform_0(%arg0: i32, %arg1: i32) -> (i32, i32) {
    %c0_i32 = arith.constant 0 : i32
    %c0_i32_0 = arith.constant 0 : i32
    return %arg0, %c0_i32 : i32, i32
  }
  func.func @transform_1(%arg0: i32, %arg1: i32) -> (i32, i32) {
    %c0_i32 = arith.constant 0 : i32
    %c0_i32_0 = arith.constant 0 : i32
    %c0_i32_1 = arith.constant 0 : i32
    return %c0_i32, %c0_i32_0 : i32, i32
  }
  func.func @transform_2(%arg0: i32, %arg1: i32) -> (i32, i32) {
    %c0_i32 = arith.constant 0 : i32
    %c0_i32_0 = arith.constant 0 : i32
    %c0_i32_1 = arith.constant 0 : i32
    return %c0_i32, %c0_i32_0 : i32, i32
  }
  func.func @transform_3(%arg0: i32, %arg1: i32) -> (i32, i32) {
    %c0_i32 = arith.constant 0 : i32
    %c0_i32_0 = arith.constant 0 : i32
    return %c0_i32, %arg1 : i32, i32
  }
  func.func @transform_4(%arg0: i32, %arg1: i32) -> (i32, i32) {
    %c0_i32 = arith.constant 0 : i32
    %c0_i32_0 = arith.constant 0 : i32
    return %c0_i32, %arg1 : i32, i32
  }
  func.func @transform_5(%arg0: i32, %arg1: i32) -> (i32, i32) {
    %c0_i32 = arith.constant 0 : i32
    return %arg0, %arg1 : i32, i32
  }
}

module attributes {stable_mosaic.version = 11 : i64} {
  func.func @_add_pos_kernel(%arg0: i32, %arg1: memref<1x8x32xbf16, #tpu.memory_space<vmem>>, %arg2: memref<8x32xbf16, #tpu.memory_space<vmem>>, %arg3: memref<1x8x32xbf16, #tpu.memory_space<vmem>>) attributes {dimension_semantics = [#tpu.dimension_semantics<parallel>], iteration_bounds = array<i64: 2>, scalar_prefetch = 0 : i64, scratch_operands = 0 : i64, tpu.core_type = #tpu.core_type<tc>, window_params = [{transform_indices = @transform_0, window_bounds = array<i64: 1, 8, 32>}, {pipeline_mode = #tpu.pipeline_mode<synchronous>, transform_indices = @transform_1, window_bounds = array<i64: 8, 32>}, {transform_indices = @transform_2, window_bounds = array<i64: 1, 8, 32>}]} {
    %c0 = arith.constant 0 : index
    %c0_0 = arith.constant 0 : index
    %c0_1 = arith.constant 0 : index
    %0 = vector.load %arg1[%c0, %c0_0, %c0_1] : memref<1x8x32xbf16, #tpu.memory_space<vmem>>, vector<1x8x32xbf16>
    %1 = arith.extf %0 : vector<1x8x32xbf16> to vector<1x8x32xf32>
    %c0_2 = arith.constant 0 : index
    %c0_3 = arith.constant 0 : index
    %2 = vector.load %arg2[%c0_2, %c0_3] : memref<8x32xbf16, #tpu.memory_space<vmem>>, vector<8x32xbf16>
    %3 = arith.extf %2 : vector<8x32xbf16> to vector<8x32xf32>
    %4 = vector.shape_cast %3 : vector<8x32xf32> to vector<1x8x32xf32>
    %5 = arith.addf %1, %4 : vector<1x8x32xf32>
    %6 = arith.truncf %5 : vector<1x8x32xf32> to vector<1x8x32xbf16>
    %c0_4 = arith.constant 0 : index
    %c0_5 = arith.constant 0 : index
    %c0_6 = arith.constant 0 : index
    %7 = vector.load %arg3[%c0_4, %c0_5, %c0_6] : memref<1x8x32xbf16, #tpu.memory_space<vmem>>, vector<1x8x32xbf16>
    tpu.vector_store %arg3[%c0_4, %c0_5, %c0_6], %6 {strides = array<i32>} : memref<1x8x32xbf16, #tpu.memory_space<vmem>>, vector<1x8x32xbf16>,
    return
  }
  func.func @transform_0(%arg0: i32) -> (i32, i32, i32) {
    %c0_i32 = arith.constant 0 : i32
    %c0_i32_0 = arith.constant 0 : i32
    %c0_i32_1 = arith.constant 0 : i32
    return %arg0, %c0_i32, %c0_i32_0 : i32, i32, i32
  }
  func.func @transform_1(%arg0: i32) -> (i32, i32) {
    %c0_i32 = arith.constant 0 : i32
    %c0_i32_0 = arith.constant 0 : i32
    %c0_i32_1 = arith.constant 0 : i32
    return %c0_i32, %c0_i32_0 : i32, i32
  }
  func.func @transform_2(%arg0: i32) -> (i32, i32, i32) {
    %c0_i32 = arith.constant 0 : i32
    %c0_i32_0 = arith.constant 0 : i32
    %c0_i32_1 = arith.constant 0 : i32
    return %arg0, %c0_i32, %c0_i32_0 : i32, i32, i32
  }
}

module attributes {stable_mosaic.version = 11 : i64} {
  func.func @_linear_residual_kernel(%arg0: i32, %arg1: i32, %arg2: i32, %arg3: memref<16x32xbf16, #tpu.memory_space<vmem>>, %arg4: memref<32x32xbf16, #tpu.memory_space<vmem>>, %arg5: memref<1x32xbf16, #tpu.memory_space<vmem>>, %arg6: memref<16x32xbf16, #tpu.memory_space<vmem>>, %arg7: memref<16x32xbf16, #tpu.memory_space<vmem>>, %arg8: memref<16x32xf32, #tpu.memory_space<vmem>>) attributes {dimension_semantics = [#tpu.dimension_semantics<parallel>, #tpu.dimension_semantics<parallel>, #tpu.dimension_semantics<arbitrary>], iteration_bounds = array<i64: 1, 1, 1>, scalar_prefetch = 0 : i64, scratch_operands = 1 : i64, tpu.core_type = #tpu.core_type<tc>, window_params = [{transform_indices = @transform_0, window_bounds = array<i64: 16, 32>}, {transform_indices = @transform_1, window_bounds = array<i64: 32, 32>}, {transform_indices = @transform_2, window_bounds = array<i64: 1, 32>}, {transform_indices = @transform_3, window_bounds = array<i64: 16, 32>}, {transform_indices = @transform_4, window_bounds = array<i64: 16, 32>}]} {
    %c0_i32 = arith.constant 0 : i32
    %0 = arith.cmpi eq, %arg2, %c0_i32 : i32
    %1 = arith.extui %0 : i1 to i32
    %c0_i32_0 = arith.constant 0 : i32
    %2 = arith.cmpi ne, %1, %c0_i32_0 : i32
    scf.if %2 {
      %cst_10 = arith.constant 0.000000e+00 : f32
      %12 = vector.broadcast %cst_10 : f32 to vector<16x32xf32>
      %c0_11 = arith.constant 0 : index
      %c0_12 = arith.constant 0 : index
      %13 = vector.load %arg8[%c0_11, %c0_12] : memref<16x32xf32, #tpu.memory_space<vmem>>, vector<16x32xf32>
      tpu.vector_store %arg8[%c0_11, %c0_12], %12 {strides = array<i32>} : memref<16x32xf32, #tpu.memory_space<vmem>>, vector<16x32xf32>,
    } else {
    }
    %c0 = arith.constant 0 : index
    %c0_1 = arith.constant 0 : index
    %3 = vector.load %arg8[%c0, %c0_1] : memref<16x32xf32, #tpu.memory_space<vmem>>, vector<16x32xf32>
    %c0_2 = arith.constant 0 : index
    %c0_3 = arith.constant 0 : index
    %4 = vector.load %arg3[%c0_2, %c0_3] : memref<16x32xbf16, #tpu.memory_space<vmem>>, vector<16x32xbf16>
    %c0_4 = arith.constant 0 : index
    %c0_5 = arith.constant 0 : index
    %5 = vector.load %arg4[%c0_4, %c0_5] : memref<32x32xbf16, #tpu.memory_space<vmem>>, vector<32x32xbf16>
    %cst = arith.constant dense<0.000000e+00> : vector<16x32xf32>
    %6 = tpu.matmul %4, %5, %cst {dimension_numbers = #tpu.dot_dimension_numbers<[1], [0], [0], [1], [0, 0, 1, 1], [], []>} : vector<16x32xbf16>, vector<32x32xbf16>, vector<16x32xf32> -> vector<16x32xf32>
    %7 = arith.addf %3, %6 : vector<16x32xf32>
    %c0_6 = arith.constant 0 : index
    %c0_7 = arith.constant 0 : index
    %8 = vector.load %arg8[%c0_6, %c0_7] : memref<16x32xf32, #tpu.memory_space<vmem>>, vector<16x32xf32>
    tpu.vector_store %arg8[%c0_6, %c0_7], %7 {strides = array<i32>} : memref<16x32xf32, #tpu.memory_space<vmem>>, vector<16x32xf32>,
    %c0_i32_8 = arith.constant 0 : i32
    %9 = arith.cmpi eq, %arg2, %c0_i32_8 : i32
    %10 = arith.extui %9 : i1 to i32
    %c0_i32_9 = arith.constant 0 : i32
    %11 = arith.cmpi ne, %10, %c0_i32_9 : i32
    scf.if %11 {
      %c0_10 = arith.constant 0 : index
      %c0_11 = arith.constant 0 : index
      %12 = vector.load %arg8[%c0_10, %c0_11] : memref<16x32xf32, #tpu.memory_space<vmem>>, vector<16x32xf32>
      %c0_12 = arith.constant 0 : index
      %c0_13 = arith.constant 0 : index
      %13 = vector.load %arg5[%c0_12, %c0_13] : memref<1x32xbf16, #tpu.memory_space<vmem>>, vector<1x32xbf16>
      %14 = arith.extf %13 : vector<1x32xbf16> to vector<1x32xf32>
      %15 = vector.broadcast %14 : vector<1x32xf32> to vector<16x32xf32>
      %16 = arith.addf %12, %15 : vector<16x32xf32>
      %c0_14 = arith.constant 0 : index
      %c0_15 = arith.constant 0 : index
      %17 = vector.load %arg6[%c0_14, %c0_15] : memref<16x32xbf16, #tpu.memory_space<vmem>>, vector<16x32xbf16>
      %18 = arith.extf %17 : vector<16x32xbf16> to vector<16x32xf32>
      %19 = arith.addf %16, %18 : vector<16x32xf32>
      %20 = arith.truncf %19 : vector<16x32xf32> to vector<16x32xbf16>
      %c0_16 = arith.constant 0 : index
      %c0_17 = arith.constant 0 : index
      %21 = vector.load %arg7[%c0_16, %c0_17] : memref<16x32xbf16, #tpu.memory_space<vmem>>, vector<16x32xbf16>
      tpu.vector_store %arg7[%c0_16, %c0_17], %20 {strides = array<i32>} : memref<16x32xbf16, #tpu.memory_space<vmem>>, vector<16x32xbf16>,
    } else {
    }
    return
  }
  func.func @transform_0(%arg0: i32, %arg1: i32, %arg2: i32) -> (i32, i32) {
    %c0_i32 = arith.constant 0 : i32
    return %arg0, %arg2 : i32, i32
  }
  func.func @transform_1(%arg0: i32, %arg1: i32, %arg2: i32) -> (i32, i32) {
    %c0_i32 = arith.constant 0 : i32
    return %arg2, %arg1 : i32, i32
  }
  func.func @transform_2(%arg0: i32, %arg1: i32, %arg2: i32) -> (i32, i32) {
    %c0_i32 = arith.constant 0 : i32
    %c0_i32_0 = arith.constant 0 : i32
    return %c0_i32, %arg1 : i32, i32
  }
  func.func @transform_3(%arg0: i32, %arg1: i32, %arg2: i32) -> (i32, i32) {
    %c0_i32 = arith.constant 0 : i32
    return %arg0, %arg1 : i32, i32
  }
  func.func @transform_4(%arg0: i32, %arg1: i32, %arg2: i32) -> (i32, i32) {
    %c0_i32 = arith.constant 0 : i32
    return %arg0, %arg1 : i32, i32
  }
}

module attributes {stable_mosaic.version = 11 : i64} {
  func.func @_mha_kernel(%arg0: i32, %arg1: memref<1x8x96xbf16, #tpu.memory_space<vmem>>, %arg2: memref<8x8xf32, #tpu.memory_space<vmem>>, %arg3: memref<1x8x32xbf16, #tpu.memory_space<vmem>>) attributes {dimension_semantics = [#tpu.dimension_semantics<parallel>], iteration_bounds = array<i64: 2>, scalar_prefetch = 0 : i64, scratch_operands = 0 : i64, tpu.core_type = #tpu.core_type<tc>, window_params = [{transform_indices = @transform_0, window_bounds = array<i64: 1, 8, 96>}, {pipeline_mode = #tpu.pipeline_mode<synchronous>, transform_indices = @transform_1, window_bounds = array<i64: 8, 8>}, {transform_indices = @transform_2, window_bounds = array<i64: 1, 8, 32>}]} {
    %c0 = arith.constant 0 : index
    %c0_0 = arith.constant 0 : index
    %0 = vector.load %arg2[%c0, %c0_0] : memref<8x8xf32, #tpu.memory_space<vmem>>, vector<8x8xf32>
    %c0_1 = arith.constant 0 : index
    %c0_2 = arith.constant 0 : index
    %c0_3 = arith.constant 0 : index
    %1 = vector.load %arg1[%c0_1, %c0_2, %c0_3] : memref<1x8x96xbf16, #tpu.memory_space<vmem>>, vector<1x8x8xbf16>
    %2 = vector.shape_cast %1 : vector<1x8x8xbf16> to vector<8x8xbf16>
    %c0_4 = arith.constant 0 : index
    %c0_5 = arith.constant 0 : index
    %c32 = arith.constant 32 : index
    %3 = vector.load %arg1[%c0_4, %c0_5, %c32] : memref<1x8x96xbf16, #tpu.memory_space<vmem>>, vector<1x8x8xbf16>
    %4 = vector.shape_cast %3 : vector<1x8x8xbf16> to vector<8x8xbf16>
    %c0_6 = arith.constant 0 : index
    %c0_7 = arith.constant 0 : index
    %c64 = arith.constant 64 : index
    %5 = vector.load %arg1[%c0_6, %c0_7, %c64] : memref<1x8x96xbf16, #tpu.memory_space<vmem>>, vector<1x8x8xbf16>
    %6 = vector.shape_cast %5 : vector<1x8x8xbf16> to vector<8x8xbf16>
    %cst = arith.constant dense<0.000000e+00> : vector<8x8xf32>
    %7 = tpu.matmul %2, %4, %cst {dimension_numbers = #tpu.dot_dimension_numbers<[1], [1], [0], [0], [0, 0, 1, 0], [], []>} : vector<8x8xbf16>, vector<8x8xbf16>, vector<8x8xf32> -> vector<8x8xf32>
    %cst_8 = arith.constant 0.353553385 : f32
    %8 = vector.broadcast %cst_8 : f32 to vector<8x8xf32>
    %9 = arith.mulf %7, %8 : vector<8x8xf32>
    %10 = arith.addf %9, %0 : vector<8x8xf32>
    %cst_9 = arith.constant dense<0xFF800000> : vector<8xf32>
    %11 = vector.multi_reduction <maximumf>, %10, %cst_9 [1] : vector<8x8xf32> to vector<8xf32>
    %12 = vector.shape_cast %11 : vector<8xf32> to vector<8x1xf32>
    %13 = vector.broadcast %12 : vector<8x1xf32> to vector<8x8xf32>
    %14 = arith.subf %10, %13 : vector<8x8xf32>
    %15 = math.exp %14 : vector<8x8xf32>
    %cst_10 = arith.constant dense<0.000000e+00> : vector<8xf32>
    %16 = vector.multi_reduction <add>, %15, %cst_10 [1] : vector<8x8xf32> to vector<8xf32>
    %17 = vector.shape_cast %16 : vector<8xf32> to vector<8x1xf32>
    %18 = tpu.reciprocal %17 {approx = true} : vector<8x1xf32> -> vector<8x1xf32>
    %19 = vector.broadcast %18 : vector<8x1xf32> to vector<8x8xf32>
    %20 = arith.mulf %15, %19 : vector<8x8xf32>
    %21 = arith.truncf %20 : vector<8x8xf32> to vector<8x8xbf16>
    %cst_11 = arith.constant dense<0.000000e+00> : vector<8x8xf32>
    %22 = tpu.matmul %21, %6, %cst_11 {dimension_numbers = #tpu.dot_dimension_numbers<[1], [0], [0], [1], [0, 0, 1, 1], [], []>} : vector<8x8xbf16>, vector<8x8xbf16>, vector<8x8xf32> -> vector<8x8xf32>
    %23 = arith.truncf %22 : vector<8x8xf32> to vector<8x8xbf16>
    %c0_12 = arith.constant 0 : index
    %c0_13 = arith.constant 0 : index
    %c0_14 = arith.constant 0 : index
    %24 = vector.load %arg3[%c0_12, %c0_13, %c0_14] : memref<1x8x32xbf16, #tpu.memory_space<vmem>>, vector<1x8x8xbf16>
    %25 = vector.shape_cast %24 : vector<1x8x8xbf16> to vector<8x8xbf16>
    %26 = vector.shape_cast %23 : vector<8x8xbf16> to vector<1x8x8xbf16>
    tpu.vector_store %arg3[%c0_12, %c0_13, %c0_14], %26 {strides = array<i32>} : memref<1x8x32xbf16, #tpu.memory_space<vmem>>, vector<1x8x8xbf16>,
    %c0_15 = arith.constant 0 : index
    %c0_16 = arith.constant 0 : index
    %c8 = arith.constant 8 : index
    %27 = vector.load %arg1[%c0_15, %c0_16, %c8] : memref<1x8x96xbf16, #tpu.memory_space<vmem>>, vector<1x8x8xbf16>
    %28 = vector.shape_cast %27 : vector<1x8x8xbf16> to vector<8x8xbf16>
    %c0_17 = arith.constant 0 : index
    %c0_18 = arith.constant 0 : index
    %c40 = arith.constant 40 : index
    %29 = vector.load %arg1[%c0_17, %c0_18, %c40] : memref<1x8x96xbf16, #tpu.memory_space<vmem>>, vector<1x8x8xbf16>
    %30 = vector.shape_cast %29 : vector<1x8x8xbf16> to vector<8x8xbf16>
    %c0_19 = arith.constant 0 : index
    %c0_20 = arith.constant 0 : index
    %c72 = arith.constant 72 : index
    %31 = vector.load %arg1[%c0_19, %c0_20, %c72] : memref<1x8x96xbf16, #tpu.memory_space<vmem>>, vector<1x8x8xbf16>
    %32 = vector.shape_cast %31 : vector<1x8x8xbf16> to vector<8x8xbf16>
    %cst_21 = arith.constant dense<0.000000e+00> : vector<8x8xf32>
    %33 = tpu.matmul %28, %30, %cst_21 {dimension_numbers = #tpu.dot_dimension_numbers<[1], [1], [0], [0], [0, 0, 1, 0], [], []>} : vector<8x8xbf16>, vector<8x8xbf16>, vector<8x8xf32> -> vector<8x8xf32>
    %cst_22 = arith.constant 0.353553385 : f32
    %34 = vector.broadcast %cst_22 : f32 to vector<8x8xf32>
    %35 = arith.mulf %33, %34 : vector<8x8xf32>
    %36 = arith.addf %35, %0 : vector<8x8xf32>
    %cst_23 = arith.constant dense<0xFF800000> : vector<8xf32>
    %37 = vector.multi_reduction <maximumf>, %36, %cst_23 [1] : vector<8x8xf32> to vector<8xf32>
    %38 = vector.shape_cast %37 : vector<8xf32> to vector<8x1xf32>
    %39 = vector.broadcast %38 : vector<8x1xf32> to vector<8x8xf32>
    %40 = arith.subf %36, %39 : vector<8x8xf32>
    %41 = math.exp %40 : vector<8x8xf32>
    %cst_24 = arith.constant dense<0.000000e+00> : vector<8xf32>
    %42 = vector.multi_reduction <add>, %41, %cst_24 [1] : vector<8x8xf32> to vector<8xf32>
    %43 = vector.shape_cast %42 : vector<8xf32> to vector<8x1xf32>
    %44 = tpu.reciprocal %43 {approx = true} : vector<8x1xf32> -> vector<8x1xf32>
    %45 = vector.broadcast %44 : vector<8x1xf32> to vector<8x8xf32>
    %46 = arith.mulf %41, %45 : vector<8x8xf32>
    %47 = arith.truncf %46 : vector<8x8xf32> to vector<8x8xbf16>
    %cst_25 = arith.constant dense<0.000000e+00> : vector<8x8xf32>
    %48 = tpu.matmul %47, %32, %cst_25 {dimension_numbers = #tpu.dot_dimension_numbers<[1], [0], [0], [1], [0, 0, 1, 1], [], []>} : vector<8x8xbf16>, vector<8x8xbf16>, vector<8x8xf32> -> vector<8x8xf32>
    %49 = arith.truncf %48 : vector<8x8xf32> to vector<8x8xbf16>
    %c0_26 = arith.constant 0 : index
    %c0_27 = arith.constant 0 : index
    %c8_28 = arith.constant 8 : index
    %50 = vector.load %arg3[%c0_26, %c0_27, %c8_28] : memref<1x8x32xbf16, #tpu.memory_space<vmem>>, vector<1x8x8xbf16>
    %51 = vector.shape_cast %50 : vector<1x8x8xbf16> to vector<8x8xbf16>
    %52 = vector.shape_cast %49 : vector<8x8xbf16> to vector<1x8x8xbf16>
    tpu.vector_store %arg3[%c0_26, %c0_27, %c8_28], %52 {strides = array<i32>} : memref<1x8x32xbf16, #tpu.memory_space<vmem>>, vector<1x8x8xbf16>,
    %c0_29 = arith.constant 0 : index
    %c0_30 = arith.constant 0 : index
    %c16 = arith.constant 16 : index
    %53 = vector.load %arg1[%c0_29, %c0_30, %c16] : memref<1x8x96xbf16, #tpu.memory_space<vmem>>, vector<1x8x8xbf16>
    %54 = vector.shape_cast %53 : vector<1x8x8xbf16> to vector<8x8xbf16>
    %c0_31 = arith.constant 0 : index
    %c0_32 = arith.constant 0 : index
    %c48 = arith.constant 48 : index
    %55 = vector.load %arg1[%c0_31, %c0_32, %c48] : memref<1x8x96xbf16, #tpu.memory_space<vmem>>, vector<1x8x8xbf16>
    %56 = vector.shape_cast %55 : vector<1x8x8xbf16> to vector<8x8xbf16>
    %c0_33 = arith.constant 0 : index
    %c0_34 = arith.constant 0 : index
    %c80 = arith.constant 80 : index
    %57 = vector.load %arg1[%c0_33, %c0_34, %c80] : memref<1x8x96xbf16, #tpu.memory_space<vmem>>, vector<1x8x8xbf16>
    %58 = vector.shape_cast %57 : vector<1x8x8xbf16> to vector<8x8xbf16>
    %cst_35 = arith.constant dense<0.000000e+00> : vector<8x8xf32>
    %59 = tpu.matmul %54, %56, %cst_35 {dimension_numbers = #tpu.dot_dimension_numbers<[1], [1], [0], [0], [0, 0, 1, 0], [], []>} : vector<8x8xbf16>, vector<8x8xbf16>, vector<8x8xf32> -> vector<8x8xf32>
    %cst_36 = arith.constant 0.353553385 : f32
    %60 = vector.broadcast %cst_36 : f32 to vector<8x8xf32>
    %61 = arith.mulf %59, %60 : vector<8x8xf32>
    %62 = arith.addf %61, %0 : vector<8x8xf32>
    %cst_37 = arith.constant dense<0xFF800000> : vector<8xf32>
    %63 = vector.multi_reduction <maximumf>, %62, %cst_37 [1] : vector<8x8xf32> to vector<8xf32>
    %64 = vector.shape_cast %63 : vector<8xf32> to vector<8x1xf32>
    %65 = vector.broadcast %64 : vector<8x1xf32> to vector<8x8xf32>
    %66 = arith.subf %62, %65 : vector<8x8xf32>
    %67 = math.exp %66 : vector<8x8xf32>
    %cst_38 = arith.constant dense<0.000000e+00> : vector<8xf32>
    %68 = vector.multi_reduction <add>, %67, %cst_38 [1] : vector<8x8xf32> to vector<8xf32>
    %69 = vector.shape_cast %68 : vector<8xf32> to vector<8x1xf32>
    %70 = tpu.reciprocal %69 {approx = true} : vector<8x1xf32> -> vector<8x1xf32>
    %71 = vector.broadcast %70 : vector<8x1xf32> to vector<8x8xf32>
    %72 = arith.mulf %67, %71 : vector<8x8xf32>
    %73 = arith.truncf %72 : vector<8x8xf32> to vector<8x8xbf16>
    %cst_39 = arith.constant dense<0.000000e+00> : vector<8x8xf32>
    %74 = tpu.matmul %73, %58, %cst_39 {dimension_numbers = #tpu.dot_dimension_numbers<[1], [0], [0], [1], [0, 0, 1, 1], [], []>} : vector<8x8xbf16>, vector<8x8xbf16>, vector<8x8xf32> -> vector<8x8xf32>
    %75 = arith.truncf %74 : vector<8x8xf32> to vector<8x8xbf16>
    %c0_40 = arith.constant 0 : index
    %c0_41 = arith.constant 0 : index
    %c16_42 = arith.constant 16 : index
    %76 = vector.load %arg3[%c0_40, %c0_41, %c16_42] : memref<1x8x32xbf16, #tpu.memory_space<vmem>>, vector<1x8x8xbf16>
    %77 = vector.shape_cast %76 : vector<1x8x8xbf16> to vector<8x8xbf16>
    %78 = vector.shape_cast %75 : vector<8x8xbf16> to vector<1x8x8xbf16>
    tpu.vector_store %arg3[%c0_40, %c0_41, %c16_42], %78 {strides = array<i32>} : memref<1x8x32xbf16, #tpu.memory_space<vmem>>, vector<1x8x8xbf16>,
    %c0_43 = arith.constant 0 : index
    %c0_44 = arith.constant 0 : index
    %c24 = arith.constant 24 : index
    %79 = vector.load %arg1[%c0_43, %c0_44, %c24] : memref<1x8x96xbf16, #tpu.memory_space<vmem>>, vector<1x8x8xbf16>
    %80 = vector.shape_cast %79 : vector<1x8x8xbf16> to vector<8x8xbf16>
    %c0_45 = arith.constant 0 : index
    %c0_46 = arith.constant 0 : index
    %c56 = arith.constant 56 : index
    %81 = vector.load %arg1[%c0_45, %c0_46, %c56] : memref<1x8x96xbf16, #tpu.memory_space<vmem>>, vector<1x8x8xbf16>
    %82 = vector.shape_cast %81 : vector<1x8x8xbf16> to vector<8x8xbf16>
    %c0_47 = arith.constant 0 : index
    %c0_48 = arith.constant 0 : index
    %c88 = arith.constant 88 : index
    %83 = vector.load %arg1[%c0_47, %c0_48, %c88] : memref<1x8x96xbf16, #tpu.memory_space<vmem>>, vector<1x8x8xbf16>
    %84 = vector.shape_cast %83 : vector<1x8x8xbf16> to vector<8x8xbf16>
    %cst_49 = arith.constant dense<0.000000e+00> : vector<8x8xf32>
    %85 = tpu.matmul %80, %82, %cst_49 {dimension_numbers = #tpu.dot_dimension_numbers<[1], [1], [0], [0], [0, 0, 1, 0], [], []>} : vector<8x8xbf16>, vector<8x8xbf16>, vector<8x8xf32> -> vector<8x8xf32>
    %cst_50 = arith.constant 0.353553385 : f32
    %86 = vector.broadcast %cst_50 : f32 to vector<8x8xf32>
    %87 = arith.mulf %85, %86 : vector<8x8xf32>
    %88 = arith.addf %87, %0 : vector<8x8xf32>
    %cst_51 = arith.constant dense<0xFF800000> : vector<8xf32>
    %89 = vector.multi_reduction <maximumf>, %88, %cst_51 [1] : vector<8x8xf32> to vector<8xf32>
    %90 = vector.shape_cast %89 : vector<8xf32> to vector<8x1xf32>
    %91 = vector.broadcast %90 : vector<8x1xf32> to vector<8x8xf32>
    %92 = arith.subf %88, %91 : vector<8x8xf32>
    %93 = math.exp %92 : vector<8x8xf32>
    %cst_52 = arith.constant dense<0.000000e+00> : vector<8xf32>
    %94 = vector.multi_reduction <add>, %93, %cst_52 [1] : vector<8x8xf32> to vector<8xf32>
    %95 = vector.shape_cast %94 : vector<8xf32> to vector<8x1xf32>
    %96 = tpu.reciprocal %95 {approx = true} : vector<8x1xf32> -> vector<8x1xf32>
    %97 = vector.broadcast %96 : vector<8x1xf32> to vector<8x8xf32>
    %98 = arith.mulf %93, %97 : vector<8x8xf32>
    %99 = arith.truncf %98 : vector<8x8xf32> to vector<8x8xbf16>
    %cst_53 = arith.constant dense<0.000000e+00> : vector<8x8xf32>
    %100 = tpu.matmul %99, %84, %cst_53 {dimension_numbers = #tpu.dot_dimension_numbers<[1], [0], [0], [1], [0, 0, 1, 1], [], []>} : vector<8x8xbf16>, vector<8x8xbf16>, vector<8x8xf32> -> vector<8x8xf32>
    %101 = arith.truncf %100 : vector<8x8xf32> to vector<8x8xbf16>
    %c0_54 = arith.constant 0 : index
    %c0_55 = arith.constant 0 : index
    %c24_56 = arith.constant 24 : index
    %102 = vector.load %arg3[%c0_54, %c0_55, %c24_56] : memref<1x8x32xbf16, #tpu.memory_space<vmem>>, vector<1x8x8xbf16>
    %103 = vector.shape_cast %102 : vector<1x8x8xbf16> to vector<8x8xbf16>
    %104 = vector.shape_cast %101 : vector<8x8xbf16> to vector<1x8x8xbf16>
    tpu.vector_store %arg3[%c0_54, %c0_55, %c24_56], %104 {strides = array<i32>} : memref<1x8x32xbf16, #tpu.memory_space<vmem>>, vector<1x8x8xbf16>,
    return
  }
  func.func @transform_0(%arg0: i32) -> (i32, i32, i32) {
    %c0_i32 = arith.constant 0 : i32
    %c0_i32_0 = arith.constant 0 : i32
    %c0_i32_1 = arith.constant 0 : i32
    return %arg0, %c0_i32, %c0_i32_0 : i32, i32, i32
  }
  func.func @transform_1(%arg0: i32) -> (i32, i32) {
    %c0_i32 = arith.constant 0 : i32
    %c0_i32_0 = arith.constant 0 : i32
    %c0_i32_1 = arith.constant 0 : i32
    return %c0_i32, %c0_i32_0 : i32, i32
  }
  func.func @transform_2(%arg0: i32) -> (i32, i32, i32) {
    %c0_i32 = arith.constant 0 : i32
    %c0_i32_0 = arith.constant 0 : i32
    %c0_i32_1 = arith.constant 0 : i32
    return %arg0, %c0_i32, %c0_i32_0 : i32, i32, i32
  }
}

module attributes {stable_mosaic.version = 11 : i64} {
  func.func @_ln_linear_kernel(%arg0: i32, %arg1: i32, %arg2: memref<16x32xbf16, #tpu.memory_space<vmem>>, %arg3: memref<1x32xf32, #tpu.memory_space<vmem>>, %arg4: memref<1x32xf32, #tpu.memory_space<vmem>>, %arg5: memref<32x128xbf16, #tpu.memory_space<vmem>>, %arg6: memref<1x128xbf16, #tpu.memory_space<vmem>>, %arg7: memref<16x128xbf16, #tpu.memory_space<vmem>>) attributes {dimension_semantics = [#tpu.dimension_semantics<parallel>, #tpu.dimension_semantics<parallel>], iteration_bounds = array<i64: 1, 1>, scalar_prefetch = 0 : i64, scratch_operands = 0 : i64, tpu.core_type = #tpu.core_type<tc>, window_params = [{transform_indices = @transform_0, window_bounds = array<i64: 16, 32>}, {pipeline_mode = #tpu.pipeline_mode<synchronous>, transform_indices = @transform_1, window_bounds = array<i64: 1, 32>}, {pipeline_mode = #tpu.pipeline_mode<synchronous>, transform_indices = @transform_2, window_bounds = array<i64: 1, 32>}, {transform_indices = @transform_3, window_bounds = array<i64: 32, 128>}, {transform_indices = @transform_4, window_bounds = array<i64: 1, 128>}, {transform_indices = @transform_5, window_bounds = array<i64: 16, 128>}]} {
    %c0 = arith.constant 0 : index
    %c0_0 = arith.constant 0 : index
    %0 = vector.load %arg2[%c0, %c0_0] : memref<16x32xbf16, #tpu.memory_space<vmem>>, vector<16x32xbf16>
    %1 = arith.extf %0 : vector<16x32xbf16> to vector<16x32xf32>
    %cst = arith.constant dense<0.000000e+00> : vector<16xf32>
    %2 = vector.multi_reduction <add>, %1, %cst [1] : vector<16x32xf32> to vector<16xf32>
    %3 = vector.shape_cast %2 : vector<16xf32> to vector<16x1xf32>
    %cst_1 = arith.constant 3.200000e+01 : f32
    %4 = vector.broadcast %cst_1 : f32 to vector<16x1xf32>
    %5 = arith.divf %3, %4 : vector<16x1xf32>
    %6 = vector.broadcast %5 : vector<16x1xf32> to vector<16x32xf32>
    %7 = arith.subf %1, %6 : vector<16x32xf32>
    %8 = arith.mulf %7, %7 : vector<16x32xf32>
    %cst_2 = arith.constant dense<0.000000e+00> : vector<16xf32>
    %9 = vector.multi_reduction <add>, %8, %cst_2 [1] : vector<16x32xf32> to vector<16xf32>
    %10 = vector.shape_cast %9 : vector<16xf32> to vector<16x1xf32>
    %cst_3 = arith.constant 3.200000e+01 : f32
    %11 = vector.broadcast %cst_3 : f32 to vector<16x1xf32>
    %12 = arith.divf %10, %11 : vector<16x1xf32>
    %13 = vector.broadcast %5 : vector<16x1xf32> to vector<16x32xf32>
    %14 = arith.subf %1, %13 : vector<16x32xf32>
    %cst_4 = arith.constant 9.99999974E-6 : f32
    %15 = vector.broadcast %cst_4 : f32 to vector<16x1xf32>
    %16 = arith.addf %12, %15 : vector<16x1xf32>
    %17 = math.rsqrt %16 : vector<16x1xf32>
    %18 = vector.broadcast %17 : vector<16x1xf32> to vector<16x32xf32>
    %19 = arith.mulf %14, %18 : vector<16x32xf32>
    %c0_5 = arith.constant 0 : index
    %c0_6 = arith.constant 0 : index
    %20 = vector.load %arg3[%c0_5, %c0_6] : memref<1x32xf32, #tpu.memory_space<vmem>>, vector<1x32xf32>
    %21 = vector.broadcast %20 : vector<1x32xf32> to vector<16x32xf32>
    %22 = arith.mulf %19, %21 : vector<16x32xf32>
    %c0_7 = arith.constant 0 : index
    %c0_8 = arith.constant 0 : index
    %23 = vector.load %arg4[%c0_7, %c0_8] : memref<1x32xf32, #tpu.memory_space<vmem>>, vector<1x32xf32>
    %24 = vector.broadcast %23 : vector<1x32xf32> to vector<16x32xf32>
    %25 = arith.addf %22, %24 : vector<16x32xf32>
    %26 = arith.truncf %25 : vector<16x32xf32> to vector<16x32xbf16>
    %c0_9 = arith.constant 0 : index
    %c0_10 = arith.constant 0 : index
    %27 = vector.load %arg5[%c0_9, %c0_10] : memref<32x128xbf16, #tpu.memory_space<vmem>>, vector<32x128xbf16>
    %cst_11 = arith.constant dense<0.000000e+00> : vector<16x128xf32>
    %28 = tpu.matmul %26, %27, %cst_11 {dimension_numbers = #tpu.dot_dimension_numbers<[1], [0], [0], [1], [0, 0, 1, 1], [], []>} : vector<16x32xbf16>, vector<32x128xbf16>, vector<16x128xf32> -> vector<16x128xf32>
    %c0_12 = arith.constant 0 : index
    %c0_13 = arith.constant 0 : index
    %29 = vector.load %arg6[%c0_12, %c0_13] : memref<1x128xbf16, #tpu.memory_space<vmem>>, vector<1x128xbf16>
    %30 = arith.extf %29 : vector<1x128xbf16> to vector<1x128xf32>
    %31 = vector.broadcast %30 : vector<1x128xf32> to vector<16x128xf32>
    %32 = arith.addf %28, %31 : vector<16x128xf32>
    %cst_14 = arith.constant 1.702000e+00 : f32
    %33 = vector.broadcast %cst_14 : f32 to vector<16x128xf32>
    %34 = arith.mulf %33, %32 : vector<16x128xf32>
    %35 = arith.negf %34 : vector<16x128xf32>
    %36 = math.exp %35 : vector<16x128xf32>
    %cst_15 = arith.constant 1.000000e+00 : f32
    %37 = vector.broadcast %cst_15 : f32 to vector<16x128xf32>
    %38 = arith.addf %37, %36 : vector<16x128xf32>
    %39 = arith.divf %37, %38 : vector<16x128xf32>
    %40 = arith.mulf %32, %39 : vector<16x128xf32>
    %41 = arith.truncf %40 : vector<16x128xf32> to vector<16x128xbf16>
    %c0_16 = arith.constant 0 : index
    %c0_17 = arith.constant 0 : index
    %42 = vector.load %arg7[%c0_16, %c0_17] : memref<16x128xbf16, #tpu.memory_space<vmem>>, vector<16x128xbf16>
    tpu.vector_store %arg7[%c0_16, %c0_17], %41 {strides = array<i32>} : memref<16x128xbf16, #tpu.memory_space<vmem>>, vector<16x128xbf16>,
    return
  }
  func.func @transform_0(%arg0: i32, %arg1: i32) -> (i32, i32) {
    %c0_i32 = arith.constant 0 : i32
    %c0_i32_0 = arith.constant 0 : i32
    return %arg0, %c0_i32 : i32, i32
  }
  func.func @transform_1(%arg0: i32, %arg1: i32) -> (i32, i32) {
    %c0_i32 = arith.constant 0 : i32
    %c0_i32_0 = arith.constant 0 : i32
    %c0_i32_1 = arith.constant 0 : i32
    return %c0_i32, %c0_i32_0 : i32, i32
  }
  func.func @transform_2(%arg0: i32, %arg1: i32) -> (i32, i32) {
    %c0_i32 = arith.constant 0 : i32
    %c0_i32_0 = arith.constant 0 : i32
    %c0_i32_1 = arith.constant 0 : i32
    return %c0_i32, %c0_i32_0 : i32, i32
  }
  func.func @transform_3(%arg0: i32, %arg1: i32) -> (i32, i32) {
    %c0_i32 = arith.constant 0 : i32
    %c0_i32_0 = arith.constant 0 : i32
    return %c0_i32, %arg1 : i32, i32
  }
  func.func @transform_4(%arg0: i32, %arg1: i32) -> (i32, i32) {
    %c0_i32 = arith.constant 0 : i32
    %c0_i32_0 = arith.constant 0 : i32
    return %c0_i32, %arg1 : i32, i32
  }
  func.func @transform_5(%arg0: i32, %arg1: i32) -> (i32, i32) {
    %c0_i32 = arith.constant 0 : i32
    return %arg0, %arg1 : i32, i32
  }
}

module attributes {stable_mosaic.version = 11 : i64} {
  func.func @_linear_residual_kernel(%arg0: i32, %arg1: i32, %arg2: i32, %arg3: memref<16x128xbf16, #tpu.memory_space<vmem>>, %arg4: memref<128x32xbf16, #tpu.memory_space<vmem>>, %arg5: memref<1x32xbf16, #tpu.memory_space<vmem>>, %arg6: memref<16x32xbf16, #tpu.memory_space<vmem>>, %arg7: memref<16x32xbf16, #tpu.memory_space<vmem>>, %arg8: memref<16x32xf32, #tpu.memory_space<vmem>>) attributes {dimension_semantics = [#tpu.dimension_semantics<parallel>, #tpu.dimension_semantics<parallel>, #tpu.dimension_semantics<arbitrary>], iteration_bounds = array<i64: 1, 1, 1>, scalar_prefetch = 0 : i64, scratch_operands = 1 : i64, tpu.core_type = #tpu.core_type<tc>, window_params = [{transform_indices = @transform_0, window_bounds = array<i64: 16, 128>}, {transform_indices = @transform_1, window_bounds = array<i64: 128, 32>}, {transform_indices = @transform_2, window_bounds = array<i64: 1, 32>}, {transform_indices = @transform_3, window_bounds = array<i64: 16, 32>}, {transform_indices = @transform_4, window_bounds = array<i64: 16, 32>}]} {
    %c0_i32 = arith.constant 0 : i32
    %0 = arith.cmpi eq, %arg2, %c0_i32 : i32
    %1 = arith.extui %0 : i1 to i32
    %c0_i32_0 = arith.constant 0 : i32
    %2 = arith.cmpi ne, %1, %c0_i32_0 : i32
    scf.if %2 {
      %cst_10 = arith.constant 0.000000e+00 : f32
      %12 = vector.broadcast %cst_10 : f32 to vector<16x32xf32>
      %c0_11 = arith.constant 0 : index
      %c0_12 = arith.constant 0 : index
      %13 = vector.load %arg8[%c0_11, %c0_12] : memref<16x32xf32, #tpu.memory_space<vmem>>, vector<16x32xf32>
      tpu.vector_store %arg8[%c0_11, %c0_12], %12 {strides = array<i32>} : memref<16x32xf32, #tpu.memory_space<vmem>>, vector<16x32xf32>,
    } else {
    }
    %c0 = arith.constant 0 : index
    %c0_1 = arith.constant 0 : index
    %3 = vector.load %arg8[%c0, %c0_1] : memref<16x32xf32, #tpu.memory_space<vmem>>, vector<16x32xf32>
    %c0_2 = arith.constant 0 : index
    %c0_3 = arith.constant 0 : index
    %4 = vector.load %arg3[%c0_2, %c0_3] : memref<16x128xbf16, #tpu.memory_space<vmem>>, vector<16x128xbf16>
    %c0_4 = arith.constant 0 : index
    %c0_5 = arith.constant 0 : index
    %5 = vector.load %arg4[%c0_4, %c0_5] : memref<128x32xbf16, #tpu.memory_space<vmem>>, vector<128x32xbf16>
    %cst = arith.constant dense<0.000000e+00> : vector<16x32xf32>
    %6 = tpu.matmul %4, %5, %cst {dimension_numbers = #tpu.dot_dimension_numbers<[1], [0], [0], [1], [0, 0, 1, 1], [], []>} : vector<16x128xbf16>, vector<128x32xbf16>, vector<16x32xf32> -> vector<16x32xf32>
    %7 = arith.addf %3, %6 : vector<16x32xf32>
    %c0_6 = arith.constant 0 : index
    %c0_7 = arith.constant 0 : index
    %8 = vector.load %arg8[%c0_6, %c0_7] : memref<16x32xf32, #tpu.memory_space<vmem>>, vector<16x32xf32>
    tpu.vector_store %arg8[%c0_6, %c0_7], %7 {strides = array<i32>} : memref<16x32xf32, #tpu.memory_space<vmem>>, vector<16x32xf32>,
    %c0_i32_8 = arith.constant 0 : i32
    %9 = arith.cmpi eq, %arg2, %c0_i32_8 : i32
    %10 = arith.extui %9 : i1 to i32
    %c0_i32_9 = arith.constant 0 : i32
    %11 = arith.cmpi ne, %10, %c0_i32_9 : i32
    scf.if %11 {
      %c0_10 = arith.constant 0 : index
      %c0_11 = arith.constant 0 : index
      %12 = vector.load %arg8[%c0_10, %c0_11] : memref<16x32xf32, #tpu.memory_space<vmem>>, vector<16x32xf32>
      %c0_12 = arith.constant 0 : index
      %c0_13 = arith.constant 0 : index
      %13 = vector.load %arg5[%c0_12, %c0_13] : memref<1x32xbf16, #tpu.memory_space<vmem>>, vector<1x32xbf16>
      %14 = arith.extf %13 : vector<1x32xbf16> to vector<1x32xf32>
      %15 = vector.broadcast %14 : vector<1x32xf32> to vector<16x32xf32>
      %16 = arith.addf %12, %15 : vector<16x32xf32>
      %c0_14 = arith.constant 0 : index
      %c0_15 = arith.constant 0 : index
      %17 = vector.load %arg6[%c0_14, %c0_15] : memref<16x32xbf16, #tpu.memory_space<vmem>>, vector<16x32xbf16>
      %18 = arith.extf %17 : vector<16x32xbf16> to vector<16x32xf32>
      %19 = arith.addf %16, %18 : vector<16x32xf32>
      %20 = arith.truncf %19 : vector<16x32xf32> to vector<16x32xbf16>
      %c0_16 = arith.constant 0 : index
      %c0_17 = arith.constant 0 : index
      %21 = vector.load %arg7[%c0_16, %c0_17] : memref<16x32xbf16, #tpu.memory_space<vmem>>, vector<16x32xbf16>
      tpu.vector_store %arg7[%c0_16, %c0_17], %20 {strides = array<i32>} : memref<16x32xbf16, #tpu.memory_space<vmem>>, vector<16x32xbf16>,
    } else {
    }
    return
  }
  func.func @transform_0(%arg0: i32, %arg1: i32, %arg2: i32) -> (i32, i32) {
    %c0_i32 = arith.constant 0 : i32
    return %arg0, %arg2 : i32, i32
  }
  func.func @transform_1(%arg0: i32, %arg1: i32, %arg2: i32) -> (i32, i32) {
    %c0_i32 = arith.constant 0 : i32
    return %arg2, %arg1 : i32, i32
  }
  func.func @transform_2(%arg0: i32, %arg1: i32, %arg2: i32) -> (i32, i32) {
    %c0_i32 = arith.constant 0 : i32
    %c0_i32_0 = arith.constant 0 : i32
    return %c0_i32, %arg1 : i32, i32
  }
  func.func @transform_3(%arg0: i32, %arg1: i32, %arg2: i32) -> (i32, i32) {
    %c0_i32 = arith.constant 0 : i32
    return %arg0, %arg1 : i32, i32
  }
  func.func @transform_4(%arg0: i32, %arg1: i32, %arg2: i32) -> (i32, i32) {
    %c0_i32 = arith.constant 0 : i32
    return %arg0, %arg1 : i32, i32
  }
}

module attributes {stable_mosaic.version = 11 : i64} {
  func.func @_ln_linear_kernel(%arg0: i32, %arg1: i32, %arg2: memref<2x32xbf16, #tpu.memory_space<vmem>>, %arg3: memref<1x32xf32, #tpu.memory_space<vmem>>, %arg4: memref<1x32xf32, #tpu.memory_space<vmem>>, %arg5: memref<32x16xbf16, #tpu.memory_space<vmem>>, %arg6: memref<1x16xf32, #tpu.memory_space<vmem>>, %arg7: memref<2x16xf32, #tpu.memory_space<vmem>>) attributes {dimension_semantics = [#tpu.dimension_semantics<parallel>, #tpu.dimension_semantics<parallel>], iteration_bounds = array<i64: 1, 1>, scalar_prefetch = 0 : i64, scratch_operands = 0 : i64, tpu.core_type = #tpu.core_type<tc>, window_params = [{transform_indices = @transform_0, window_bounds = array<i64: 2, 32>}, {pipeline_mode = #tpu.pipeline_mode<synchronous>, transform_indices = @transform_1, window_bounds = array<i64: 1, 32>}, {pipeline_mode = #tpu.pipeline_mode<synchronous>, transform_indices = @transform_2, window_bounds = array<i64: 1, 32>}, {transform_indices = @transform_3, window_bounds = array<i64: 32, 16>}, {transform_indices = @transform_4, window_bounds = array<i64: 1, 16>}, {transform_indices = @transform_5, window_bounds = array<i64: 2, 16>}]} {
    %c0 = arith.constant 0 : index
    %c0_0 = arith.constant 0 : index
    %0 = vector.load %arg2[%c0, %c0_0] : memref<2x32xbf16, #tpu.memory_space<vmem>>, vector<2x32xbf16>
    %1 = arith.extf %0 : vector<2x32xbf16> to vector<2x32xf32>
    %cst = arith.constant dense<0.000000e+00> : vector<2xf32>
    %2 = vector.multi_reduction <add>, %1, %cst [1] : vector<2x32xf32> to vector<2xf32>
    %3 = vector.shape_cast %2 : vector<2xf32> to vector<2x1xf32>
    %cst_1 = arith.constant 3.200000e+01 : f32
    %4 = vector.broadcast %cst_1 : f32 to vector<2x1xf32>
    %5 = arith.divf %3, %4 : vector<2x1xf32>
    %6 = vector.broadcast %5 : vector<2x1xf32> to vector<2x32xf32>
    %7 = arith.subf %1, %6 : vector<2x32xf32>
    %8 = arith.mulf %7, %7 : vector<2x32xf32>
    %cst_2 = arith.constant dense<0.000000e+00> : vector<2xf32>
    %9 = vector.multi_reduction <add>, %8, %cst_2 [1] : vector<2x32xf32> to vector<2xf32>
    %10 = vector.shape_cast %9 : vector<2xf32> to vector<2x1xf32>
    %cst_3 = arith.constant 3.200000e+01 : f32
    %11 = vector.broadcast %cst_3 : f32 to vector<2x1xf32>
    %12 = arith.divf %10, %11 : vector<2x1xf32>
    %13 = vector.broadcast %5 : vector<2x1xf32> to vector<2x32xf32>
    %14 = arith.subf %1, %13 : vector<2x32xf32>
    %cst_4 = arith.constant 9.99999974E-6 : f32
    %15 = vector.broadcast %cst_4 : f32 to vector<2x1xf32>
    %16 = arith.addf %12, %15 : vector<2x1xf32>
    %17 = math.rsqrt %16 : vector<2x1xf32>
    %18 = vector.broadcast %17 : vector<2x1xf32> to vector<2x32xf32>
    %19 = arith.mulf %14, %18 : vector<2x32xf32>
    %c0_5 = arith.constant 0 : index
    %c0_6 = arith.constant 0 : index
    %20 = vector.load %arg3[%c0_5, %c0_6] : memref<1x32xf32, #tpu.memory_space<vmem>>, vector<1x32xf32>
    %21 = vector.broadcast %20 : vector<1x32xf32> to vector<2x32xf32>
    %22 = arith.mulf %19, %21 : vector<2x32xf32>
    %c0_7 = arith.constant 0 : index
    %c0_8 = arith.constant 0 : index
    %23 = vector.load %arg4[%c0_7, %c0_8] : memref<1x32xf32, #tpu.memory_space<vmem>>, vector<1x32xf32>
    %24 = vector.broadcast %23 : vector<1x32xf32> to vector<2x32xf32>
    %25 = arith.addf %22, %24 : vector<2x32xf32>
    %26 = arith.truncf %25 : vector<2x32xf32> to vector<2x32xbf16>
    %c0_9 = arith.constant 0 : index
    %c0_10 = arith.constant 0 : index
    %27 = vector.load %arg5[%c0_9, %c0_10] : memref<32x16xbf16, #tpu.memory_space<vmem>>, vector<32x16xbf16>
    %cst_11 = arith.constant dense<0.000000e+00> : vector<2x16xf32>
    %28 = tpu.matmul %26, %27, %cst_11 {dimension_numbers = #tpu.dot_dimension_numbers<[1], [0], [0], [1], [0, 0, 1, 1], [], []>} : vector<2x32xbf16>, vector<32x16xbf16>, vector<2x16xf32> -> vector<2x16xf32>
    %c0_12 = arith.constant 0 : index
    %c0_13 = arith.constant 0 : index
    %29 = vector.load %arg6[%c0_12, %c0_13] : memref<1x16xf32, #tpu.memory_space<vmem>>, vector<1x16xf32>
    %30 = vector.broadcast %29 : vector<1x16xf32> to vector<2x16xf32>
    %31 = arith.addf %28, %30 : vector<2x16xf32>
    %c0_14 = arith.constant 0 : index
    %c0_15 = arith.constant 0 : index
    %32 = vector.load %arg7[%c0_14, %c0_15] : memref<2x16xf32, #tpu.memory_space<vmem>>, vector<2x16xf32>
    tpu.vector_store %arg7[%c0_14, %c0_15], %31 {strides = array<i32>} : memref<2x16xf32, #tpu.memory_space<vmem>>, vector<2x16xf32>,
    return
  }
  func.func @transform_0(%arg0: i32, %arg1: i32) -> (i32, i32) {
    %c0_i32 = arith.constant 0 : i32
    %c0_i32_0 = arith.constant 0 : i32
    return %arg0, %c0_i32 : i32, i32
  }
  func.func @transform_1(%arg0: i32, %arg1: i32) -> (i32, i32) {
    %c0_i32 = arith.constant 0 : i32
    %c0_i32_0 = arith.constant 0 : i32
    %c0_i32_1 = arith.constant 0 : i32
    return %c0_i32, %c0_i32_0 : i32, i32
  }
  func.func @transform_2(%arg0: i32, %arg1: i32) -> (i32, i32) {
    %c0_i32 = arith.constant 0 : i32
    %c0_i32_0 = arith.constant 0 : i32
    %c0_i32_1 = arith.constant 0 : i32
    return %c0_i32, %c0_i32_0 : i32, i32
  }
  func.func @transform_3(%arg0: i32, %arg1: i32) -> (i32, i32) {
    %c0_i32 = arith.constant 0 : i32
    %c0_i32_0 = arith.constant 0 : i32
    return %c0_i32, %arg1 : i32, i32
  }
  func.func @transform_4(%arg0: i32, %arg1: i32) -> (i32, i32) {
    %c0_i32 = arith.constant 0 : i32
    %c0_i32_0 = arith.constant 0 : i32
    return %c0_i32, %arg1 : i32, i32
  }
  func.func @transform_5(%arg0: i32, %arg1: i32) -> (i32, i32) {
    %c0_i32 = arith.constant 0 : i32
    return %arg0, %arg1 : i32, i32
  }
}

</mosaic_0001>

<bundles_post_ra>
// kernel: text_encoder_forward.12
= control target key start
LH: loop header
LB: loop body
LE: loop exit
PB: predicated region body
PF: predicated region fallthrough
CT: control target
= control target key end

     0   :  { %s221_s9 = smov 0   ;;  %s249_s0 = inlined_call_operand.vmem [shape: bf16[2,8,32], index: 0, kind: input, shape index: {}]   ;;  %s250_s1 = inlined_call_operand.vmem [shape: bf16[8,32], index: 1, kind: input, shape index: {}]   ;;  %s251_s2 = inlined_call_operand.vmem [shape: bf16[2,8,32], index: 2, kind: output, shape index: {}]  }
   0x1 LB: > { %s200_s10 = sadd.s32 4294967295, %s223_s9   ;;  %p204_p0 = scmp.ge.s32.totalorder %s223_s9, 1  ;;  %s223_s9 = sphi %s221_s9, %s12_s9  }
   0x2   : > { %p111_p1 = scmp.lt.s32.totalorder %s223_s9, 3 }
   0x4   : > { %p112_p2 = pnand %p204_p0, %p111_p1 }
   0x5   : > { %p131_p3 = scmp.lt.s32.totalorder (!%p112_p2), %s200_s10, 1 }
   0x6   : > { %115 = sbr.rel (%p112_p2) target bundleno = 22 (0x16), region = 28 }
   0xb   : > { %s253_s10 = smov (!%p131_p3, %s200_s10), 1  ;;  %v141_v0 = vld [vmem:[%s250_s1] sm:$0xf]  ;;  %vm145_vm0 = vcmask 257024  }
   0xc   : > { %s205_s13 = sshll.u32 %s253_s10, 2  ;;  %v142_v1 = vunpack.c.l.bf16 %v141_v0 }
   0xd   : > { %s134_s16 = scalar_lea.vmem %s249_s0, %s205_s13  ;;  %s138_s19 = scalar_lea.vmem %s251_s2, %s205_s13 }
   0xe   : > { %v139_v2 = vld [vmem:[%s134_s16] sm:$0xf] }
   0xf   : > { %v140_v3 = vunpack.c.l.bf16 %v139_v2 }
  0x11   : > { %v143_v4 = vadd.f32 %v142_v1, %v140_v3 }
  0x13   : > { %v144_v5 = vpack.c.bf16 %v143_v4, %v143_v4 }
  0x15   : > { %146 = vst.msk [vmem:[%s138_s19] sm:$0xf] %vm145_vm0, %v144_v5 }
  0x16 PF: > { %s12_s9 = sadd.s32 1, %s223_s9  }
  0x17   : > { %p9_p4 = scmp.ge.s32.totalorder %s12_s9, 4  }
  0x19   :  { %11 = sbr.rel (!%p9_p4) target bundleno = 1 (0x1), region = 58 }

// kernel: text_encoder_forward.13
= control target key start
LH: loop header
LB: loop body
LE: loop exit
PB: predicated region body
PF: predicated region fallthrough
CT: control target
= control target key end

     0   :  { %vm25_vm0 = vcmask 261120   ;;  %v159_v5 = vmov 32.0   ;;  %vm128_vm8 = vcmask 781312   ;;  %s219_s0 = inlined_call_operand.vmem [shape: bf16[16,32], index: 0, kind: input, shape index: {}]   ;;  %s220_s1 = inlined_call_operand.vmem [shape: f32[1,32], index: 1, kind: input, shape index: {}]   ;;  %s221_s2 = inlined_call_operand.vmem [shape: f32[1,32], index: 2, kind: input, shape index: {}]   ;;  %s222_s3 = inlined_call_operand.vmem [shape: bf16[32,96], index: 3, kind: input, shape index: {}]   ;;  %s223_s4 = inlined_call_operand.vmem [shape: bf16[1,96], index: 4, kind: input, shape index: {}]   ;;  %s224_s5 = inlined_call_operand.vmem [shape: bf16[16,96], index: 5, kind: output, shape index: {}]  }
   0x1   :  { %v147_v0 = vld [vmem:[%s219_s0] sm:$0xff]   ;;  %153 = vrcp.f32 %v159_v5  ;;  %v145_v22 = vld [vmem:[%s222_s3 + $0x8] sm:$0xff] }
   0x2   :  { %v148_v1 = vunpack.c.l.bf16 %v147_v0  ;;  %v149_v3 = vunpack.c.h.bf16 %v147_v0  ;;  %118 = vmatpush.bf16.msra.mxu0 %v145_v22  ;;  %v144_v24 = vld [vmem:[%s222_s3] sm:$0xff] }
   0x3   :  { %v151_v43 = vld [vmem:[%s220_s1] ss:$0 sm:$0xff] }
   0x4   :  { %v26_v2 = vsel %vm25_vm0, %v148_v1, 0.0  ;;  %v29_v4 = vsel %vm25_vm0, %v149_v3, 0.0  ;;  %v152_v48 = vld [vmem:[%s221_s2] ss:$0 sm:$0xff] }
   0x5   :  { %27 = vadd.xlane.f32.xlu0 %v26_v2  ;;  %v94_v53 = vld [vmem:[%s223_s4] sm:$0x1] }
   0x6   :  { %119 = vmatpush.bf16.msra.mxu0 %v144_v24  ;;  %v95_v54 = vunpack.c.l.bf16 %v94_v53 }
   0x7   :  { %v154_v6 = vpop.eup %153 }
   0x8   :  { %v33_v7 = vmul.f32 32.0, %v154_v6  ;;  %vm37_vm1 = vweird.f32 %v154_v6  ;;  %v96_v55 = vperm.slane %v95_v54, 0 }
   0xa   :  { %v34_v8 = vsub.f32 1.0, %v33_v7 }
   0xc   :  { %v35_v9 = vmul.f32 %v154_v6, %v34_v8 }
   0xd   :  { %30 = vadd.xlane.f32.xlu0 %v29_v4 }
   0xe   :  { %v36_v10 = vadd.f32 %v154_v6, %v35_v9 }
  0x10   :  { %v38_v11 = vsel %vm37_vm1, %v154_v6, %v36_v10 }
  0x78   :  { %v28_v12 = vpop.xlane.xlu0 %27 }
  0x79   :  { %v39_v13 = vmul.f32 %v38_v11, %v28_v12 }
  0x7b   :  { %v41_v14 = vsub.f32 %v148_v1, %v39_v13 }
  0x7d   :  { %v43_v15 = vmul.f32 %v41_v14, %v41_v14 }
  0x7f   :  { %v45_v16 = vsel %vm25_vm0, %v43_v15, 0.0 }
  0x80   :  { %46 = vadd.xlane.f32.xlu1 %v45_v16  ;;  %v31_v17 = vpop.xlane.xlu0 %30 }
  0x81   :  { %v40_v18 = vmul.f32 %v38_v11, %v31_v17 }
  0x83   :  { %v42_v19 = vsub.f32 %v149_v3, %v40_v18 }
  0x85   :  { %v44_v20 = vmul.f32 %v42_v19, %v42_v19 }
  0x87   :  { %v48_v21 = vsel %vm25_vm0, %v44_v20, 0.0 }
  0x88   :  { %49 = vadd.xlane.f32.xlu1 %v48_v21 }
  0xf3   :  { %v47_v23 = vpop.xlane.xlu1 %46 }
  0xf4   :  { %v51_v25 = vmul.f32 %v47_v23, %v38_v11 }
  0xf6   :  { %v53_v26 = vadd.f32 1e-05, %v51_v25 }
  0xf8   :  { %155 = vrsqrt.f32 %v53_v26  ;;  %vm61_vm3 = vweird.f32 %v53_v26 }
  0xfb   :  { %v50_v27 = vpop.xlane.xlu1 %49 }
  0xfc   :  { %v52_v28 = vmul.f32 %v50_v27, %v38_v11 }
  0xfe   :  { %v156_v29 = vpop.eup %155  ;;  %v54_v30 = vadd.f32 1e-05, %v52_v28 }
  0xff   :  { %v56_v31 = vmul.f32 %v156_v29, %v53_v26  ;;  %vm62_vm2 = vweird.f32 %v156_v29 }
 0x100   :  { %157 = vrsqrt.f32 %v54_v30  ;;  %vm63_vm4 = vmor %vm61_vm3, %vm62_vm2  ;;  %vm71_vm6 = vweird.f32 %v54_v30 }
 0x101   :  { %v57_v32 = vmul.f32 %v156_v29, %v56_v31 }
 0x103   :  { %v58_v33 = vmul.f32 0.5, %v57_v32 }
 0x105   :  { %v59_v34 = vsub.f32 1.5, %v58_v33 }
 0x106   :  { %v158_v35 = vpop.eup %157 }
 0x107   :  { %v60_v36 = vmul.f32 %v156_v29, %v59_v34  ;;  %v66_v37 = vmul.f32 %v158_v35, %v54_v30  ;;  %vm72_vm5 = vweird.f32 %v158_v35 }
 0x108   :  { %vm73_vm7 = vmor %vm71_vm6, %vm72_vm5 }
 0x109   :  { %v67_v38 = vmul.f32 %v158_v35, %v66_v37  ;;  %v64_v39 = vsel %vm63_vm4, %v156_v29, %v60_v36 }
 0x10a   :  { %v75_v42 = vmul.f32 %v64_v39, %v41_v14 }
 0x10b   :  { %v68_v40 = vmul.f32 0.5, %v67_v38 }
 0x10c   :  { %v81_v47 = vmul.f32 %v151_v43, %v75_v42 }
 0x10d   :  { %v69_v41 = vsub.f32 1.5, %v68_v40 }
 0x10e   :  { %v87_v50 = vadd.f32 %v152_v48, %v81_v47 }
 0x10f   :  { %v70_v44 = vmul.f32 %v158_v35, %v69_v41 }
 0x111   :  { %v74_v45 = vsel %vm73_vm7, %v158_v35, %v70_v44 }
 0x112   :  { %v76_v46 = vmul.f32 %v74_v45, %v42_v19 }
 0x114   :  { %v82_v49 = vmul.f32 %v151_v43, %v76_v46 }
 0x116   :  { %v88_v51 = vadd.f32 %v152_v48, %v82_v49 }
 0x118   :  { %v89_v52 = vpack.c.bf16 %v88_v51, %v87_v50 }
 0x11a   :  { %143 = vmatmul.msk.bf16.vlgmr.msra.gmra.mxu0 %vm25_vm0, %v89_v52 }
 0x197   :  { %v121_v56 = vpop.f32.mrf.mxu0 }
 0x198   :  { %v122_v57 = vadd.f32 %v121_v56, %v96_v55 }
 0x19a   :  { %v126_v58 = vpack.c.bf16 %v122_v57, %v122_v57 }
 0x19c   :  { %129 = vst.msk [vmem:[%s224_s5] sm:$0xf] %vm128_vm8, %v126_v58 }
 0x19f   :  { %v123_v59 = vpop.f32.mrf.mxu0 }
 0x1a0   :  { %v124_v60 = vadd.f32 %v123_v59, %v96_v55 }
 0x1a2   :  { %v127_v61 = vpack.c.bf16 %v124_v60, %v124_v60 }
 0x1a4   :  { %130 = vst.msk [vmem:[%s224_s5 + $0x4] sm:$0xf] %vm128_vm8, %v127_v61 }

// kernel: text_encoder_forward.15
= control target key start
LH: loop header
LB: loop body
LE: loop exit
PB: predicated region body
PF: predicated region fallthrough
CT: control target
= control target key end

     0   :  { %vm22_vm0 = vcmask 261120   ;;  %v118_v1 = vmov 0.0   ;;  %vm90_vm1 = vcmask 257024   ;;  %s170_s1 = inlined_call_operand.vmem [shape: bf16[32,32], index: 1, kind: input, shape index: {}]   ;;  %s171_s0 = inlined_call_operand.vmem [shape: bf16[16,32], index: 0, kind: input, shape index: {}]   ;;  %s172_s2 = inlined_call_operand.vmem [shape: bf16[1,32], index: 2, kind: input, shape index: {}]   ;;  %s173_s3 = inlined_call_operand.vmem [shape: bf16[16,32], index: 3, kind: input, shape index: {}]   ;;  %s174_s4 = inlined_call_operand.vmem [shape: bf16[16,32], index: 4, kind: output, shape index: {}]  }
   0x1   :  { %v112_v0 = vld [vmem:[%s170_s1 + $0x8] sm:$0xff]  ;;  %23 = vst.msk [vmem:[#allocation2] sm:$0xff] %vm22_vm0, %v118_v1  ;;  %v111_v2 = vld [vmem:[%s170_s1] sm:$0xff] }
   0x2   :  { %24 = vst.msk [vmem:[#allocation2 + $0x8] sm:$0xff] %vm22_vm0, %v118_v1  ;;  %60 = vmatpush.bf16.msra.mxu0 %v112_v0  ;;  %v110_v3 = vld [vmem:[%s171_s0] sm:$0xff] }
   0x3   :  { %v77_v6 = vld [vmem:[%s172_s2] sm:$0x1] }
   0x4   :  { %v78_v8 = vunpack.c.l.bf16 %v77_v6  ;;  %v114_v9 = vld [vmem:[%s173_s3] sm:$0xff]  }
   0x5   :  { %v115_v13 = vunpack.c.l.bf16 %v114_v9  ;;  %v116_v19 = vunpack.c.h.bf16 %v114_v9 }
   0x6   :  { %61 = vmatpush.bf16.msra.mxu0 %v111_v2  ;;  %v79_v11 = vperm.slane %v78_v8, 0 }
   0x8   :  { %v25_v4 = vld [vmem:[#allocation2] sm:$0xff] }
   0x9   :  { %109 = vmatmul.msk.bf16.vlgmr.msra.gmra.mxu0 %vm22_vm0, %v110_v3  ;;  %v26_v10 = vld [vmem:[#allocation2 + $0x8] sm:$0xff] }
  0x86   :  { %v63_v5 = vpop.f32.mrf.mxu0 }
  0x87   :  { %v68_v7 = vadd.f32 %v63_v5, %v25_v4 }
  0x89   :  { %70 = vst.msk [vmem:[#allocation2] sm:$0xff] %vm22_vm0, %v68_v7 }
  0x8e   :  { %v65_v12 = vpop.f32.mrf.mxu0 }
  0x8f   :  { %v69_v14 = vadd.f32 %v65_v12, %v26_v10 }
  0x90   :  { %v75_v15 = vld [vmem:[#allocation2] sm:$0xff] }
  0x91   :  { %v80_v16 = vadd.f32 %v79_v11, %v75_v15  ;;  %71 = vst.msk [vmem:[#allocation2 + $0x8] sm:$0xff] %vm22_vm0, %v69_v14 }
  0x93   :  { %v86_v17 = vadd.f32 %v115_v13, %v80_v16 }
  0x95   :  { %v88_v18 = vpack.c.bf16 %v86_v17, %v86_v17 }
  0x97   :  { %91 = vst.msk [vmem:[%s174_s4] sm:$0xf] %vm90_vm1, %v88_v18 }
  0x98   :  { %v76_v20 = vld [vmem:[#allocation2 + $0x8] sm:$0xff] }
  0x99   :  { %v81_v21 = vadd.f32 %v79_v11, %v76_v20 }
  0x9b   :  { %v87_v22 = vadd.f32 %v116_v19, %v81_v21 }
  0x9d   :  { %v89_v23 = vpack.c.bf16 %v87_v22, %v87_v22 }
  0x9f   :  { %92 = vst.msk [vmem:[%s174_s4 + $0x4] sm:$0xf] %vm90_vm1, %v89_v23 }

// kernel: text_encoder_forward.14
= control target key start
LH: loop header
LB: loop body
LE: loop exit
PB: predicated region body
PF: predicated region fallthrough
CT: control target
= control target key end

     0   :  { %s558_s9 = smov 0   ;;  %s631_s0 = inlined_call_operand.vmem [shape: bf16[2,8,96], index: 0, kind: input, shape index: {}]   ;;  %s632_s1 = inlined_call_operand.vmem [shape: f32[8,8], index: 1, kind: input, shape index: {}]   ;;  %s633_s2 = inlined_call_operand.vmem [shape: bf16[2,8,32], index: 2, kind: output, shape index: {}]  }
   0x1 LB: > { %s466_s10 = sadd.s32 4294967295, %s527_s9   ;;  %p470_p0 = scmp.ge.s32.totalorder %s527_s9, 1  ;;  %s527_s9 = sphi %s558_s9, %s12_s9  }
   0x2   : > { %p111_p1 = scmp.lt.s32.totalorder %s527_s9, 3 }
   0x4   : > { %p112_p2 = pnand %p470_p0, %p111_p1 }
   0x5   : > { %p131_p3 = scmp.lt.s32.totalorder (!%p112_p2), %s466_s10, 1  ;;  %s529_s15 = smov (!%p112_p2), 96  }
   0x6   : > { %115 = sbr.rel (%p112_p2) target bundleno = 1200 (0x4b0), region = 28  ;;  %s530_s16 = smov (!%p112_p2), 88  }
   0x7   : > { %s531_s17 = smov (!%p112_p2), 120   ;;  %s532_s18 = smov (!%p112_p2), 64  }
   0x8   : > { %s533_s19 = smov (!%p112_p2), 80   ;;  %s534_s20 = smov (!%p112_p2), 72  }
   0x9   : > { %s535_s21 = smov (!%p112_p2), 112   ;;  %s536_s24 = smov (!%p112_p2), 104  }
   0xa   : > { %s537_s25 = smov (!%p112_p2), 56   ;;  %s538_s26 = smov (!%p112_p2), 40  }
   0xb   : > { %s635_s10 = smov (!%p131_p3, %s466_s10), 1  ;;  %vm147_vm0 = vcmask 64512   ;;  %v589_v18 = vld [vmem:[%s632_s1] sm:$0xff]  ;;  %vm186_vm1 = vcmask 1043456   ;;  %vm204_vm2 = vcmask 60416   ;;  %s539_s30 = smov 48  }
   0xc   : > { %s471_s11 = sshll.u32 %s635_s10, 2  ;;  %s540_s3 = smov 8   ;;  %vm273_vm3 = vcmask 126016   ;;  %vm342_vm4 = vcmask 191616   ;;  %vm411_vm5 = vcmask 257216  }
   0xd   : > { %s134_s14 = scalar_lea.vmem %s631_s0, %s471_s11  ;;  %s610_s29 = scalar_lea.vmem %s633_s2, %s471_s11 }
   0xe   : > { %v141_v0 = vld [vmem:[%s134_s14] sm:$0xf]  ;;  %s541_s4 = smov 16   ;;  %s542_s5 = smov 24  }
   0xf   : > { %v143_v1 = vunpack.c.l.b16 %v141_v0  ;;  %v206_v3 = vld [vmem:[%s134_s14] sm:$0xf] }
  0x10   : > { %v208_v4 = vunpack.c.l.b16 %v206_v3  ;;  %v275_v8 = vld [vmem:[%s134_s14] sm:$0xf] }
  0x11   : > { %v144_v2 = vpack.c.b16 %v143_v1, %v143_v1  ;;  %v277_v10 = vunpack.c.l.b16 %v275_v8  ;;  %v344_v12 = vld [vmem:[%s134_s14] sm:$0xf] }
  0x12   : > { %v574_v5 = vpack.c.b16 %v208_v4, %v208_v4  ;;  %v346_v14 = vunpack.c.l.b16 %v344_v12 }
  0x13   : > { %145 = vrot.lane.b32.xlu0 %v144_v2, %s529_s15  ;;  %v581_v13 = vpack.c.b16 %v277_v10, %v277_v10 }
  0x14   : > { %212 = vrot.lane.b32.xlu1 %v574_v5, %s530_s16  ;;  %210 = vrot.lane.b32.xlu2 %v574_v5, %s531_s17  ;;  %v347_v16 = vpack.c.b16 %v346_v14, %v346_v14 }
  0x1c   : > { %181 = vrot.lane.b32.xlu2 %v144_v2, %s532_s18 }
  0x24   : > { %281 = vrot.lane.b32.xlu2 %v581_v13, %s533_s19 }
  0x2c   : > { %350 = vrot.lane.b32.xlu2 %v347_v16, %s534_s20 }
  0x34   : > { %279 = vrot.lane.b32.xlu2 %v581_v13, %s535_s21 }
  0x3c   : > { %348 = vrot.lane.b32.xlu2 %v347_v16, %s536_s24 }
  0x6e   : > { %v211_v15 = vpop.permute.xlu2 %210 }
  0x76   : > { %v182_v23 = vpop.permute.xlu2 %181 }
  0x77   : > { %v188_v28 = vsel %vm186_vm1, %v182_v23, 0 }
  0x78   : > { %197 = vmatpush.bf16.msra.mxu1 %v188_v28 }
  0x7e   : > { %v282_v24 = vpop.permute.xlu2 %281 }
  0x7f   : > { %v287_v26 = vsel %vm147_vm0, %v282_v24, 0 }
  0x80   : > { %296 = vmatpush.bf16.xpose.msrb.mxu1 %v287_v26 }
  0x85   : > { %v146_v6 = vpop.permute.xlu0 %145 }
  0x86   : > { %v152_v7 = vsel %vm147_vm0, %v146_v6, 0  ;;  %v213_v9 = vpop.permute.xlu1 %212  ;;  %v351_v25 = vpop.permute.xlu2 %350 }
  0x87   : > { %161 = vmatpush.bf16.xpose.msra.mxu0 %v152_v7  ;;  %v218_v11 = vsel %vm147_vm0, %v213_v9, 0  ;;  %v356_v27 = vsel %vm147_vm0, %v351_v25, 0 }
  0x88   : > { %227 = vmatpush.bf16.xpose.msra.mxu2 %v218_v11 }
  0x8e   : > { %473 = vmatmul.msk.bf16.vlgmr.msra.gmra.mxu0 %vm147_vm0, %v141_v0  ;;  %v280_v29 = vpop.permute.xlu2 %279 }
  0x8f   : > { %475 = vmatmul.msk.bf16.vlgmr.msra.gmra.mxu2 %vm147_vm0, %v211_v15  ;;  %365 = vmatpush.bf16.xpose.msrb.mxu0 %v356_v27 }
  0x96   : > { %v349_v32 = vpop.permute.xlu2 %348 }
  0x9e   : > { %479 = vmatmul.msk.bf16.vlgmr.msrb.gmra.mxu0 %vm147_vm0, %v349_v32 }
 0x10b   : > { %v163_v17 = vpop.f32.mrf.mxu0 }
 0x10c   : > { %v167_v19 = vmul.f32 0.35355338, %v163_v17 }
 0x10e   : > { %v168_v20 = vadd.f32 %v167_v19, %v589_v18 }
 0x110   : > { %v169_v21 = vsel %vm147_vm0, %v168_v20, -inf }
 0x111   : > { %170 = vmax.xlane.f32.xlu0 %v169_v21 }
 0x112   : > { %v229_v30 = vpop.f32.mrf.mxu2 }
 0x113   : > { %v165_v22 = vpop.f32.mrf.mxu0  ;;  %v233_v31 = vmul.f32 0.35355338, %v229_v30 }
 0x115   : > { %v234_v33 = vadd.f32 %v233_v31, %v589_v18 }
 0x117   : > { %v235_v35 = vsel %vm147_vm0, %v234_v33, -inf }
 0x118   : > { %236 = vmax.xlane.f32.xlu2 %v235_v35 }
 0x11a   : > { %v231_v38 = vpop.f32.mrf.mxu2 }
 0x11b   : > { %v367_v41 = vpop.f32.mrf.mxu0 }
 0x11c   : > { %v371_v42 = vmul.f32 0.35355338, %v367_v41 }
 0x11e   : > { %v372_v43 = vadd.f32 %v371_v42, %v589_v18 }
 0x120   : > { %v373_v45 = vsel %vm147_vm0, %v372_v43, -inf }
 0x123   : > { %v369_v46 = vpop.f32.mrf.mxu0 }
 0x184   : > { %v171_v34 = vpop.xlane.xlu0 %170 }
 0x185   : > { %v172_v36 = vsub.f32 %v168_v20, %v171_v34 }
 0x187   : > { %v173_v37 = vmul.f32 1.442695, %v172_v36 }
 0x189   : > { %505 = vpow2.f32 %v173_v37 }
 0x18b   : > { %v237_v53 = vpop.xlane.xlu2 %236 }
 0x18c   : > { %v238_v54 = vsub.f32 %v234_v33, %v237_v53 }
 0x18e   : > { %v239_v55 = vmul.f32 1.442695, %v238_v54 }
 0x18f   : > { %v506_v39 = vpop.eup %505 }
 0x190   : > { %v175_v40 = vsel %vm147_vm0, %v506_v39, 0.0 }
 0x191   : > { %176 = vadd.xlane.f32.xlu1 %v175_v40 }
 0x199   : > { %374 = vmax.xlane.f32.xlu1 %v373_v45 }
 0x1b2   : > { %247 = vrot.lane.b32.xlu1 %v574_v5, %s537_s25 }
 0x1ba   : > { %385 = vrot.lane.b32.xlu1 %v347_v16, %s538_s26 }
 0x204   : > { %v177_v44 = vpop.xlane.xlu1 %176 }
 0x205   : > { %507 = vrcp.f32 %v177_v44 }
 0x206   : > { %509 = vpow2.f32 %v239_v55 }
 0x20b   : > { %v508_v47 = vpop.eup %507 }
 0x20c   : > { %v179_v48 = vmul.f32 %v508_v47, %v506_v39  ;;  %v375_v57 = vpop.xlane.xlu1 %374  ;;  %v510_v0 = vpop.eup %509 }
 0x20d   : > { %v376_v60 = vsub.f32 %v372_v43, %v375_v57  ;;  %v241_v1 = vsel %vm147_vm0, %v510_v0, 0.0 }
 0x20e   : > { %v180_v49 = vpack.c.bf16 %v179_v48, %v179_v48 }
 0x20f   : > { %v377_v62 = vmul.f32 1.442695, %v376_v60 }
 0x210   : > { %474 = vmatmul.msk.bf16.vlgmr.msra.gmra.mxu1 %vm147_vm0, %v180_v49 }
 0x211   : > { %511 = vpow2.f32 %v377_v62 }
 0x217   : > { %v512_v2 = vpop.eup %511 }
 0x218   : > { %v379_v3 = vsel %vm147_vm0, %v512_v2, 0.0 }
 0x220   : > { %477 = vmatmul.msk.bf16.vlgmr.msrb.gmra.mxu1 %vm147_vm0, %v280_v29 }
 0x224   : > { %v248_v4 = vpop.permute.xlu1 %247 }
 0x225   : > { %v253_v5 = vsel %vm186_vm1, %v248_v4, 0 }
 0x226   : > { %262 = vmatpush.bf16.msra.mxu3 %v253_v5 }
 0x22c   : > { %v386_v6 = vpop.permute.xlu1 %385 }
 0x22d   : > { %v391_v7 = vsel %vm186_vm1, %v386_v6, 0 }
 0x22e   : > { %400 = vmatpush.bf16.msrb.mxu2 %v391_v7 }
 0x28d   : > { %v199_v50 = vpop.f32.mrf.mxu1 }
 0x28e   : > { %v203_v51 = vpack.c.bf16 %v199_v50, %v199_v50 }
 0x290   : > { %205 = vst.msk [vmem:[%s610_s29] sm:$0xf] %vm204_vm2, %v203_v51 }
 0x295   : > { %v201_v52 = vpop.f32.mrf.mxu1 }
 0x29d   : > { %v298_v56 = vpop.f32.mrf.mxu1 }
 0x29e   : > { %v302_v58 = vmul.f32 0.35355338, %v298_v56 }
 0x2a0   : > { %v303_v59 = vadd.f32 %v302_v58, %v589_v18 }
 0x2a2   : > { %v304_v61 = vsel %vm147_vm0, %v303_v59, -inf }
 0x2a3   : > { %305 = vmax.xlane.f32.xlu0 %v304_v61 }
 0x2a5   : > { %v300_v63 = vpop.f32.mrf.mxu1 }
 0x2ab   : > { %242 = vadd.xlane.f32.xlu0 %v241_v1 }
 0x2b3   : > { %380 = vadd.xlane.f32.xlu0 %v379_v3 }
 0x316   : > { %v306_v8 = vpop.xlane.xlu0 %305 }
 0x317   : > { %v307_v9 = vsub.f32 %v303_v59, %v306_v8 }
 0x319   : > { %v308_v10 = vmul.f32 1.442695, %v307_v9 }
 0x31b   : > { %513 = vpow2.f32 %v308_v10 }
 0x31e   : > { %v243_v11 = vpop.xlane.xlu0 %242 }
 0x31f   : > { %515 = vrcp.f32 %v243_v11 }
 0x321   : > { %v514_v12 = vpop.eup %513 }
 0x322   : > { %v310_v14 = vsel %vm147_vm0, %v514_v12, 0.0 }
 0x323   : > { %311 = vadd.xlane.f32.xlu0 %v310_v14 }
 0x325   : > { %v516_v15 = vpop.eup %515 }
 0x326   : > { %v381_v16 = vpop.xlane.xlu0 %380  ;;  %v245_v17 = vmul.f32 %v516_v15, %v510_v0 }
 0x327   : > { %517 = vrcp.f32 %v381_v16 }
 0x328   : > { %v246_v18 = vpack.c.bf16 %v245_v17, %v245_v17 }
 0x32a   : > { %476 = vmatmul.msk.bf16.vlgmr.msra.gmra.mxu3 %vm147_vm0, %v246_v18 }
 0x32d   : > { %v518_v19 = vpop.eup %517 }
 0x32e   : > { %v383_v20 = vmul.f32 %v518_v19, %v512_v2 }
 0x330   : > { %v384_v21 = vpack.c.bf16 %v383_v20, %v383_v20 }
 0x332   : > { %480 = vmatmul.msk.bf16.vlgmr.msrb.gmra.mxu2 %vm147_vm0, %v384_v21 }
 0x337   : > { %316 = vrot.lane.b32.xlu0 %v581_v13, %s539_s30 }
 0x396   : > { %v312_v22 = vpop.xlane.xlu0 %311 }
 0x397   : > { %519 = vrcp.f32 %v312_v22 }
 0x39d   : > { %v520_v23 = vpop.eup %519 }
 0x39e   : > { %v314_v24 = vmul.f32 %v520_v23, %v514_v12 }
 0x3a0   : > { %v315_v27 = vpack.c.bf16 %v314_v24, %v314_v24 }
 0x3a9   : > { %v317_v25 = vpop.permute.xlu0 %316 }
 0x3aa   : > { %v322_v26 = vsel %vm186_vm1, %v317_v25, 0 }
 0x3ab   : > { %331 = vmatpush.bf16.msrb.mxu3 %v322_v26 }
 0x3ad   : > { %v264_v28 = vpop.f32.mrf.mxu3 }
 0x3ae   : > { %v268_v29 = vpack.c.bf16 %v264_v28, %v264_v28  ;;  %478 = vmatmul.msk.bf16.vlgmr.msrb.gmra.mxu3 %vm147_vm0, %v315_v27 }
 0x3b0   : > { %270 = vrot.lane.b32.xlu2 %v268_v29, %s540_s3 }
 0x3b5   : > { %v266_v30 = vpop.f32.mrf.mxu3  ;;  %v402_v31 = vpop.f32.mrf.mxu2 }
 0x3b6   : > { %v406_v36 = vpack.c.bf16 %v402_v31, %v402_v31 }
 0x3bd   : > { %v404_v13 = vpop.f32.mrf.mxu2 }
 0x40a   : > { %v271_v32 = vpop.permute.xlu2 %270 }
 0x40b   : > { %274 = vst.msk [vmem:[%s610_s29] sm:$0xf] %vm273_vm3, %v271_v32 }
 0x431   : > { %v333_v33 = vpop.f32.mrf.mxu3 }
 0x432   : > { %v337_v34 = vpack.c.bf16 %v333_v33, %v333_v33 }
 0x434   : > { %339 = vrot.lane.b32.xlu1 %v337_v34, %s541_s4 }
 0x439   : > { %v335_v35 = vpop.f32.mrf.mxu3 }
 0x43c   : > { %408 = vrot.lane.b32.xlu1 %v406_v36, %s542_s5 }
 0x4a6   : > { %v340_v37 = vpop.permute.xlu1 %339 }
 0x4a7   : > { %343 = vst.msk [vmem:[%s610_s29] sm:$0xf] %vm342_vm4, %v340_v37 }
 0x4ae   : > { %v409_v38 = vpop.permute.xlu1 %408 }
 0x4af   : > { %412 = vst.msk [vmem:[%s610_s29] sm:$0xf] %vm411_vm5, %v409_v38 }
 0x4b0 PF: > { %s12_s9 = sadd.s32 1, %s527_s9  }
 0x4b1   : > { %p9_p4 = scmp.ge.s32.totalorder %s12_s9, 4  }
 0x4b3   :  { %11 = sbr.rel (!%p9_p4) target bundleno = 1 (0x1), region = 58 }

// kernel: text_encoder_forward.16
= control target key start
LH: loop header
LB: loop body
LE: loop exit
PB: predicated region body
PF: predicated region fallthrough
CT: control target
= control target key end

     0   :  { %vm25_vm0 = vcmask 261120   ;;  %v215_v5 = vmov 32.0   ;;  %s272_s0 = inlined_call_operand.vmem [shape: bf16[16,32], index: 0, kind: input, shape index: {}]   ;;  %s273_s1 = inlined_call_operand.vmem [shape: f32[1,32], index: 1, kind: input, shape index: {}]   ;;  %s274_s2 = inlined_call_operand.vmem [shape: f32[1,32], index: 2, kind: input, shape index: {}]   ;;  %s275_s3 = inlined_call_operand.vmem [shape: bf16[32,128], index: 3, kind: input, shape index: {}]   ;;  %s276_s4 = inlined_call_operand.vmem [shape: bf16[1,128], index: 4, kind: input, shape index: {}]   ;;  %s277_s5 = inlined_call_operand.vmem [shape: bf16[16,128], index: 5, kind: output, shape index: {}]  }
   0x1   :  { %v190_v0 = vld [vmem:[%s272_s0] sm:$0xff]   ;;  %201 = vrcp.f32 %v215_v5  ;;  %v188_v22 = vld [vmem:[%s275_s3 + $0x8] sm:$0xff] }
   0x2   :  { %v191_v1 = vunpack.c.l.bf16 %v190_v0  ;;  %v192_v3 = vunpack.c.h.bf16 %v190_v0  ;;  %118 = vmatpush.bf16.msra.mxu0 %v188_v22  ;;  %v187_v24 = vld [vmem:[%s275_s3] sm:$0xff] }
   0x3   :  { %v199_v43 = vld [vmem:[%s273_s1] ss:$0 sm:$0xff] }
   0x4   :  { %v26_v2 = vsel %vm25_vm0, %v191_v1, 0.0  ;;  %v29_v4 = vsel %vm25_vm0, %v192_v3, 0.0  ;;  %v200_v48 = vld [vmem:[%s274_s2] ss:$0 sm:$0xff] }
   0x5   :  { %27 = vadd.xlane.f32.xlu0 %v26_v2  ;;  %v94_v53 = vld [vmem:[%s276_s4] sm:$0x1] }
   0x6   :  { %119 = vmatpush.bf16.msra.mxu0 %v187_v24  ;;  %v95_v54 = vunpack.c.l.bf16 %v94_v53 }
   0x7   :  { %v202_v6 = vpop.eup %201 }
   0x8   :  { %v33_v7 = vmul.f32 32.0, %v202_v6  ;;  %vm37_vm1 = vweird.f32 %v202_v6  ;;  %v96_v55 = vperm.slane %v95_v54, 0 }
   0xa   :  { %v34_v8 = vsub.f32 1.0, %v33_v7 }
   0xc   :  { %v35_v9 = vmul.f32 %v202_v6, %v34_v8 }
   0xd   :  { %30 = vadd.xlane.f32.xlu0 %v29_v4 }
   0xe   :  { %v36_v10 = vadd.f32 %v202_v6, %v35_v9 }
  0x10   :  { %v38_v11 = vsel %vm37_vm1, %v202_v6, %v36_v10 }
  0x78   :  { %v28_v12 = vpop.xlane.xlu0 %27 }
  0x79   :  { %v39_v13 = vmul.f32 %v38_v11, %v28_v12 }
  0x7b   :  { %v41_v14 = vsub.f32 %v191_v1, %v39_v13 }
  0x7d   :  { %v43_v15 = vmul.f32 %v41_v14, %v41_v14 }
  0x7f   :  { %v45_v16 = vsel %vm25_vm0, %v43_v15, 0.0 }
  0x80   :  { %46 = vadd.xlane.f32.xlu1 %v45_v16  ;;  %v31_v17 = vpop.xlane.xlu0 %30 }
  0x81   :  { %v40_v18 = vmul.f32 %v38_v11, %v31_v17 }
  0x83   :  { %v42_v19 = vsub.f32 %v192_v3, %v40_v18 }
  0x85   :  { %v44_v20 = vmul.f32 %v42_v19, %v42_v19 }
  0x87   :  { %v48_v21 = vsel %vm25_vm0, %v44_v20, 0.0 }
  0x88   :  { %49 = vadd.xlane.f32.xlu1 %v48_v21 }
  0xf3   :  { %v47_v23 = vpop.xlane.xlu1 %46 }
  0xf4   :  { %v51_v25 = vmul.f32 %v47_v23, %v38_v11 }
  0xf6   :  { %v53_v26 = vadd.f32 1e-05, %v51_v25 }
  0xf8   :  { %203 = vrsqrt.f32 %v53_v26  ;;  %vm61_vm3 = vweird.f32 %v53_v26 }
  0xfb   :  { %v50_v27 = vpop.xlane.xlu1 %49 }
  0xfc   :  { %v52_v28 = vmul.f32 %v50_v27, %v38_v11 }
  0xfe   :  { %v204_v29 = vpop.eup %203  ;;  %v54_v30 = vadd.f32 1e-05, %v52_v28 }
  0xff   :  { %v56_v31 = vmul.f32 %v204_v29, %v53_v26  ;;  %vm62_vm2 = vweird.f32 %v204_v29 }
 0x100   :  { %205 = vrsqrt.f32 %v54_v30  ;;  %vm63_vm4 = vmor %vm61_vm3, %vm62_vm2  ;;  %vm71_vm6 = vweird.f32 %v54_v30 }
 0x101   :  { %v57_v32 = vmul.f32 %v204_v29, %v56_v31 }
 0x103   :  { %v58_v33 = vmul.f32 0.5, %v57_v32 }
 0x105   :  { %v59_v34 = vsub.f32 1.5, %v58_v33 }
 0x106   :  { %v206_v35 = vpop.eup %205 }
 0x107   :  { %v60_v36 = vmul.f32 %v204_v29, %v59_v34  ;;  %v66_v37 = vmul.f32 %v206_v35, %v54_v30  ;;  %vm72_vm5 = vweird.f32 %v206_v35 }
 0x108   :  { %vm73_vm7 = vmor %vm71_vm6, %vm72_vm5 }
 0x109   :  { %v67_v38 = vmul.f32 %v206_v35, %v66_v37  ;;  %v64_v39 = vsel %vm63_vm4, %v204_v29, %v60_v36 }
 0x10a   :  { %v75_v42 = vmul.f32 %v64_v39, %v41_v14 }
 0x10b   :  { %v68_v40 = vmul.f32 0.5, %v67_v38 }
 0x10c   :  { %v81_v47 = vmul.f32 %v199_v43, %v75_v42 }
 0x10d   :  { %v69_v41 = vsub.f32 1.5, %v68_v40 }
 0x10e   :  { %v87_v50 = vadd.f32 %v200_v48, %v81_v47 }
 0x10f   :  { %v70_v44 = vmul.f32 %v206_v35, %v69_v41 }
 0x111   :  { %v74_v45 = vsel %vm73_vm7, %v206_v35, %v70_v44 }
 0x112   :  { %v76_v46 = vmul.f32 %v74_v45, %v42_v19 }
 0x114   :  { %v82_v49 = vmul.f32 %v199_v43, %v76_v46 }
 0x116   :  { %v88_v51 = vadd.f32 %v200_v48, %v82_v49 }
 0x118   :  { %v89_v52 = vpack.c.bf16 %v88_v51, %v87_v50 }
 0x11a   :  { %184 = vmatmul.msk.bf16.vlgmr.msra.gmra.mxu0 %vm25_vm0, %v89_v52 }
 0x197   :  { %v121_v56 = vpop.f32.mrf.mxu0 }
 0x198   :  { %v122_v57 = vadd.f32 %v121_v56, %v96_v55 }
 0x19a   :  { %v185_v58 = vmul.f32 -1.702, %v122_v57 }
 0x19c   :  { %v130_v59 = vmul.f32 1.442695, %v185_v58 }
 0x19e   :  { %207 = vpow2.f32 %v130_v59 }
 0x19f   :  { %v123_v60 = vpop.f32.mrf.mxu0 }
 0x1a0   :  { %v124_v61 = vadd.f32 %v123_v60, %v96_v55 }
 0x1a2   :  { %v186_v62 = vmul.f32 -1.702, %v124_v61 }
 0x1a4   :  { %v208_v63 = vpop.eup %207  ;;  %v132_v0 = vmul.f32 1.442695, %v186_v62 }
 0x1a5   :  { %v134_v1 = vadd.f32 1.0, %v208_v63 }
 0x1a6   :  { %209 = vpow2.f32 %v132_v0 }
 0x1a7   :  { %211 = vrcp.f32 %v134_v1  ;;  %v147_v11 = vand.u32 2147483648, %v134_v1  ;;  %vm141_vm9 = vweird.f32 %v134_v1  ;;  %v145_v12 = vand.u32 2147483647, %v134_v1 }
 0x1a9   :  { %v148_v18 = vor.u32 1.1754944e-38, %v147_v11  ;;  %vm146_vm12 = vcmp.eq.f32.partialorder %v145_v12, 8.507059e+37 }
 0x1ac   :  { %v210_v2 = vpop.eup %209 }
 0x1ad   :  { %v212_v3 = vpop.eup %211  ;;  %v135_v4 = vadd.f32 1.0, %v210_v2 }
 0x1ae   :  { %v137_v5 = vmul.f32 %v212_v3, %v134_v1  ;;  %vm142_vm8 = vweird.f32 %v212_v3 }
 0x1af   :  { %213 = vrcp.f32 %v135_v4  ;;  %vm143_vm10 = vmor %vm141_vm9, %vm142_vm8  ;;  %v162_v14 = vand.u32 2147483648, %v135_v4  ;;  %v160_v17 = vand.u32 2147483647, %v135_v4  ;;  %vm156_vm13 = vweird.f32 %v135_v4 }
 0x1b0   :  { %v138_v6 = vsub.f32 1.0, %v137_v5 }
 0x1b1   :  { %v163_v21 = vor.u32 1.1754944e-38, %v162_v14  ;;  %vm161_vm15 = vcmp.eq.f32.partialorder %v160_v17, 8.507059e+37 }
 0x1b2   :  { %v139_v7 = vmul.f32 %v212_v3, %v138_v6 }
 0x1b4   :  { %v140_v9 = vadd.f32 %v212_v3, %v139_v7 }
 0x1b5   :  { %v214_v8 = vpop.eup %213 }
 0x1b6   :  { %v152_v10 = vmul.f32 %v214_v8, %v135_v4  ;;  %v144_v15 = vsel %vm143_vm10, %v212_v3, %v140_v9  ;;  %vm157_vm11 = vweird.f32 %v214_v8 }
 0x1b7   :  { %v149_v20 = vsel %vm146_vm12, %v148_v18, %v144_v15  ;;  %vm158_vm14 = vmor %vm156_vm13, %vm157_vm11 }
 0x1b8   :  { %v153_v13 = vsub.f32 1.0, %v152_v10  ;;  %v166_v24 = vmul.f32 %v149_v20, %v122_v57 }
 0x1ba   :  { %v154_v16 = vmul.f32 %v214_v8, %v153_v13 }
 0x1bc   :  { %v155_v19 = vadd.f32 %v214_v8, %v154_v16 }
 0x1be   :  { %v159_v22 = vsel %vm158_vm14, %v214_v8, %v155_v19 }
 0x1bf   :  { %v164_v23 = vsel %vm161_vm15, %v163_v21, %v159_v22 }
 0x1c0   :  { %v167_v25 = vmul.f32 %v164_v23, %v124_v61 }
 0x1c2   :  { %v196_v26 = vpack.c.bf16 %v167_v25, %v166_v24 }
 0x1c4   :  { %197 = vst [vmem:[%s277_s5] sm:$0xff] %v196_v26  }

// kernel: text_encoder_forward.17
= control target key start
LH: loop header
LB: loop body
LE: loop exit
PB: predicated region body
PF: predicated region fallthrough
CT: control target
= control target key end

     0   :  { %vm21_vm0 = vcmask 261120   ;;  %v192_v2 = vmov 0.0   ;;  %vm135_vm1 = vcmask 257024   ;;  %s261_s1 = inlined_call_operand.vmem [shape: bf16[128,32], index: 1, kind: input, shape index: {}]   ;;  %s262_s0 = inlined_call_operand.vmem [shape: bf16[16,128], index: 0, kind: input, shape index: {}]   ;;  %s263_s2 = inlined_call_operand.vmem [shape: bf16[1,32], index: 2, kind: input, shape index: {}]   ;;  %s264_s3 = inlined_call_operand.vmem [shape: bf16[16,32], index: 3, kind: input, shape index: {}]   ;;  %s265_s4 = inlined_call_operand.vmem [shape: bf16[16,32], index: 4, kind: output, shape index: {}]  }
   0x1   :  { %v186_v0 = vld [vmem:[%s261_s1 + $0x38] sm:$0xff]  ;;  %v185_v1 = vld [vmem:[%s261_s1 + $0x30] sm:$0xff]  ;;  %22 = vst.msk [vmem:[#allocation2] sm:$0xff] %vm21_vm0, %v192_v2  ;;  %v184_v3 = vld [vmem:[%s261_s1 + $0x28] sm:$0xff] }
   0x2   :  { %98 = vmatpush.bf16.msra.mxu0 %v186_v0  ;;  %23 = vst.msk [vmem:[#allocation2 + $0x8] sm:$0xff] %vm21_vm0, %v192_v2  ;;  %v183_v4 = vld [vmem:[%s261_s1 + $0x20] sm:$0xff]  ;;  %v182_v5 = vld [vmem:[%s261_s1 + $0x18] sm:$0xff]  ;;  %v181_v6 = vld [vmem:[%s261_s1 + $0x10] sm:$0xff] }
   0x3   :  { %v180_v7 = vld [vmem:[%s261_s1 + $0x8] sm:$0xff]  ;;  %v179_v8 = vld [vmem:[%s261_s1] sm:$0xff] }
   0x4   :  { %v178_v9 = vld [vmem:[%s262_s0] sm:$0xff] }
   0x5   :  { %v122_v12 = vld [vmem:[%s263_s2] sm:$0x1] }
   0x6   :  { %99 = vmatpush.bf16.msra.mxu0 %v185_v1  ;;  %v123_v14 = vunpack.c.l.bf16 %v122_v12  ;;  %v188_v15 = vld [vmem:[%s264_s3] sm:$0xff]  }
   0x7   :  { %v189_v19 = vunpack.c.l.bf16 %v188_v15  ;;  %v190_v25 = vunpack.c.h.bf16 %v188_v15 }
   0x8   :  { %v24_v10 = vld [vmem:[#allocation2] sm:$0xff]  ;;  %v124_v17 = vperm.slane %v123_v14, 0 }
   0x9   :  { %v25_v16 = vld [vmem:[#allocation2 + $0x8] sm:$0xff] }
   0xa   :  { %100 = vmatpush.bf16.msra.mxu0 %v184_v3 }
   0xe   :  { %101 = vmatpush.bf16.msra.mxu0 %v183_v4 }
  0x12   :  { %102 = vmatpush.bf16.msra.mxu0 %v182_v5 }
  0x16   :  { %103 = vmatpush.bf16.msra.mxu0 %v181_v6 }
  0x1a   :  { %104 = vmatpush.bf16.msra.mxu0 %v180_v7 }
  0x1e   :  { %105 = vmatpush.bf16.msra.mxu0 %v179_v8 }
  0x21   :  { %106 = vmatmul.bf16.vlgmr.msra.gmra.mxu0 %v178_v9 }
  0x9e   :  { %v107_v11 = vpop.f32.mrf.mxu0 }
  0x9f   :  { %v112_v13 = vadd.f32 %v107_v11, %v24_v10 }
  0xa1   :  { %115 = vst.msk [vmem:[#allocation2] sm:$0xff] %vm21_vm0, %v112_v13 }
  0xa6   :  { %v109_v18 = vpop.f32.mrf.mxu0 }
  0xa7   :  { %v113_v20 = vadd.f32 %v109_v18, %v25_v16 }
  0xa8   :  { %v120_v21 = vld [vmem:[#allocation2] sm:$0xff] }
  0xa9   :  { %v125_v22 = vadd.f32 %v124_v17, %v120_v21  ;;  %116 = vst.msk [vmem:[#allocation2 + $0x8] sm:$0xff] %vm21_vm0, %v113_v20 }
  0xab   :  { %v131_v23 = vadd.f32 %v189_v19, %v125_v22 }
  0xad   :  { %v133_v24 = vpack.c.bf16 %v131_v23, %v131_v23 }
  0xaf   :  { %136 = vst.msk [vmem:[%s265_s4] sm:$0xf] %vm135_vm1, %v133_v24 }
  0xb0   :  { %v121_v26 = vld [vmem:[#allocation2 + $0x8] sm:$0xff] }
  0xb1   :  { %v126_v27 = vadd.f32 %v124_v17, %v121_v26 }
  0xb3   :  { %v132_v28 = vadd.f32 %v190_v25, %v126_v27 }
  0xb5   :  { %v134_v29 = vpack.c.bf16 %v132_v28, %v132_v28 }
  0xb7   :  { %137 = vst.msk [vmem:[%s265_s4 + $0x4] sm:$0xf] %vm135_vm1, %v134_v29 }

// kernel: text_encoder_forward.23
= control target key start
LH: loop header
LB: loop body
LE: loop exit
PB: predicated region body
PF: predicated region fallthrough
CT: control target
= control target key end

     0   :  { %vm24_vm0 = vcmask 254976   ;;  %s221_s0 = inlined_call_operand.vmem [shape: bf16[2,32], index: 0, kind: input, shape index: {}]   ;;  %s222_s1 = inlined_call_operand.vmem [shape: f32[1,32], index: 1, kind: input, shape index: {}]   ;;  %s223_s2 = inlined_call_operand.vmem [shape: f32[1,32], index: 2, kind: input, shape index: {}]   ;;  %s224_s3 = inlined_call_operand.vmem [shape: bf16[32,16], index: 3, kind: input, shape index: {}]   ;;  %s225_s4 = inlined_call_operand.vmem [shape: f32[1,16], index: 4, kind: input, shape index: {}]   ;;  %s226_s5 = inlined_call_operand.hbm [shape: f32[2,16], index: 5, kind: output, shape index: {}]  }
   0x1   :  { %v22_v0 = vld [vmem:[%s221_s0] sm:$0x1] }
   0x2   :  { %v23_v1 = vunpack.c.l.bf16 %v22_v0 }
   0x3   :  { %10 = vsyncpa [#allocation3], 0  ;;  %v166_v3 = vmov 32.0   ;;  %v130_v15 = vld [vmem:[%s224_s3 + $0x8] sm:$0xff]  ;;  %v129_v16 = vld [vmem:[%s224_s3] sm:$0xff]  ;;  %vm85_vm5 = vcmask 261120  }
   0x4   :  { %v25_v2 = vsel %vm24_vm0, %v23_v1, 0.0  ;;  %136 = vrcp.f32 %v166_v3  ;;  %95 = vmatpush.bf16.msra.mxu0 %v130_v15  ;;  %v133_v26 = vld [vmem:[%s222_s1] ss:$0 sm:$0xff]  ;;  %s167_s28 = smov [#allocation2]   ;;  %s111_s1 = sshll.u32 %s226_s5, 4  ;;  %vm102_vm6 = vcmask 123904   ;;  %s112_s1 = int_to_ptr.hbm [resolvable:$true] %s111_s1 }
   0x5   :  { %26 = vadd.xlane.f32.xlu0 %v25_v2  ;;  %v134_v29 = vld [vmem:[%s223_s2] ss:$0 sm:$0xff]  ;;  %s109_s29 = sshll.u32 %s167_s28, 4  ;;  %s110_s29 = int_to_ptr.vmem [resolvable:$true] %s109_s29 }
   0x6   :  { %v135_v33 = vld [vmem:[%s225_s4] ss:$0 sm:$0xff] }
   0x8   :  { %96 = vmatpush.bf16.msra.mxu0 %v129_v16 }
   0xa   :  { %v137_v4 = vpop.eup %136 }
   0xb   :  { %v29_v5 = vmul.f32 32.0, %v137_v4  ;;  %vm33_vm1 = vweird.f32 %v137_v4 }
   0xd   :  { %v30_v6 = vsub.f32 1.0, %v29_v5 }
   0xf   :  { %v31_v7 = vmul.f32 %v137_v4, %v30_v6 }
  0x11   :  { %v32_v8 = vadd.f32 %v137_v4, %v31_v7 }
  0x13   :  { %v34_v9 = vsel %vm33_vm1, %v137_v4, %v32_v8 }
  0x78   :  { %v27_v10 = vpop.xlane.xlu0 %26 }
  0x79   :  { %v35_v11 = vmul.f32 %v34_v9, %v27_v10 }
  0x7b   :  { %v36_v12 = vsub.f32 %v23_v1, %v35_v11 }
  0x7d   :  { %v37_v13 = vmul.f32 %v36_v12, %v36_v12 }
  0x7f   :  { %v38_v14 = vsel %vm24_vm0, %v37_v13, 0.0 }
  0x80   :  { %39 = vadd.xlane.f32.xlu0 %v38_v14 }
  0xf3   :  { %v40_v17 = vpop.xlane.xlu0 %39 }
  0xf4   :  { %v41_v18 = vmul.f32 %v40_v17, %v34_v9 }
  0xf6   :  { %v42_v19 = vadd.f32 1e-05, %v41_v18 }
  0xf8   :  { %138 = vrsqrt.f32 %v42_v19  ;;  %vm49_vm3 = vweird.f32 %v42_v19 }
  0xfe   :  { %v139_v20 = vpop.eup %138 }
  0xff   :  { %v44_v21 = vmul.f32 %v139_v20, %v42_v19  ;;  %vm50_vm2 = vweird.f32 %v139_v20 }
 0x100   :  { %vm51_vm4 = vmor %vm49_vm3, %vm50_vm2 }
 0x101   :  { %v45_v22 = vmul.f32 %v139_v20, %v44_v21 }
 0x103   :  { %v46_v23 = vmul.f32 0.5, %v45_v22 }
 0x105   :  { %v47_v24 = vsub.f32 1.5, %v46_v23 }
 0x107   :  { %v48_v25 = vmul.f32 %v139_v20, %v47_v24 }
 0x109   :  { %v52_v27 = vsel %vm51_vm4, %v139_v20, %v48_v25 }
 0x10a   :  { %v53_v28 = vmul.f32 %v52_v27, %v36_v12 }
 0x10c   :  { %v58_v30 = vmul.f32 %v133_v26, %v53_v28 }
 0x10e   :  { %v63_v31 = vadd.f32 %v134_v29, %v58_v30 }
 0x110   :  { %v64_v32 = vpack.c.bf16 %v63_v31, %v63_v31 }
 0x112   :  { %128 = vmatmul.msk.bf16.vlgmr.msra.gmra.mxu0 %vm85_vm5, %v64_v32 }
 0x18f   :  { %v98_v34 = vpop.f32.mrf.mxu0 }
 0x190   :  { %v99_v35 = vadd.f32 %v135_v33, %v98_v34 }
 0x192   :  { %103 = vst.msk [vmem:[#allocation2] sm:$0x3] %vm102_vm6, %v99_v35 }
 0x193   :  { %114 = dma.vmem_to_hbm [thread:$0]  %s110_s29, 32, %s112_s1, [#allocation3]  }
 0x197   :  { %v100_v36 = vpop.f32.mrf.mxu0 }
 0x198   :  { %164 = dma.done.wait [#allocation3], 32  }
 0x199   :  { %165 = vsyncadd [#allocation3], 4294967264 }
 0x19a   :  { %119 = vsyncpa [#allocation3], 1 }

</bundles_post_ra>
